<compile_context>
chip_gen: v7x
topology: tpu7x:2x2x1
jax: 0.10.0
libtpu: 0.0.40
codegen_flags: <defaults>
</compile_context>

<pallas_src>
import jax
import jax.numpy as jnp
from jax.experimental import pallas as pl
from jax.experimental.pallas import tpu as pltpu

EPS = 1e-3  # BatchNorm2d(eps=0.001)


def _bn_kernel(x_ref, gamma_ref, beta_ref, o_ref):
    # x_ref:      (N, C, HW)  — C on the sublane axis, HW on the lane axis.
    # gamma/beta: (1, C, 1)   — per-channel affine parameters.
    x = x_ref[...].astype(jnp.float32)
    n, _, hw = x.shape
    inv_r = 1.0 / float(n * hw)

    # Single-pass batch statistics: sum and sum-of-squares over (N, HW).
    s = jnp.sum(x, axis=2, keepdims=True)        # (N, C, 1)  lane (XLU) reduce
    ss = jnp.sum(x * x, axis=2, keepdims=True)   # (N, C, 1)
    if n > 1:                                    # static; skipped for N == 1
        s = jnp.sum(s, axis=0, keepdims=True)
        ss = jnp.sum(ss, axis=0, keepdims=True)

    mean = s * inv_r                             # (1, C, 1)
    var = ss * inv_r - mean * mean               # biased variance (PyTorch norm)
    var = jnp.maximum(var, 0.0)                  # guard cancellation round-off
    inv = jax.lax.rsqrt(var + EPS)               # EUP rsqrt

    # Fold affine: y = x * scale + shift  (2 VALU ops per element).
    scale = inv * gamma_ref[...]                 # (1, C, 1)
    shift = beta_ref[...] - mean * scale         # (1, C, 1)
    o_ref[...] = (x * scale + shift).astype(o_ref.dtype)


def batchnorm2d_pallas(x_nchw, gamma, beta):
    """x_nchw: (N, C, H, W); gamma/beta: (C,). Returns (N, C, H, W)."""
    N, C, H, W = x_nchw.shape
    HW = H * W

    # Free reshapes only (NCHW is contiguous as (N, C, H*W)); no transposes.
    x3 = x_nchw.reshape(N, C, HW)
    g3 = gamma.reshape(1, C, 1).astype(jnp.float32)
    b3 = beta.reshape(1, C, 1).astype(jnp.float32)

    out3 = pl.pallas_call(
        _bn_kernel,
        out_shape=jax.ShapeDtypeStruct((N, C, HW), x_nchw.dtype),
        grid_spec=pl.GridSpec(
            grid=(1,),
            in_specs=[
                pl.BlockSpec((N, C, HW), lambda i: (0, 0, 0)),
                pl.BlockSpec((1, C, 1), lambda i: (0, 0, 0)),
                pl.BlockSpec((1, C, 1), lambda i: (0, 0, 0)),
            ],
            out_specs=pl.BlockSpec((N, C, HW), lambda i: (0, 0, 0)),
        ),
        compiler_params=pltpu.CompilerParams(
            dimension_semantics=("arbitrary",)
        ),
    )(x3, g3, b3)

    return out3.reshape(N, C, H, W)


def batchnorm2d_ref(x_nchw, gamma, beta):
    mean = jnp.mean(x_nchw, axis=(0, 2, 3), keepdims=True)
    var = jnp.mean((x_nchw - mean) ** 2, axis=(0, 2, 3), keepdims=True)
    g = gamma.reshape(1, -1, 1, 1)
    b = beta.reshape(1, -1, 1, 1)
    return (x_nchw - mean) * jax.lax.rsqrt(var + EPS) * g + b


if __name__ == "__main__":
    key = jax.random.PRNGKey(0)
    kx, kg, kb = jax.random.split(key, 3)

    N, C, H, W = 1, 384, 7, 7  # shape implied by the module's forward
    x = jax.random.normal(kx, (N, C, H, W), dtype=jnp.float32)
    # PyTorch default init is gamma=1, beta=0; perturb deterministically so
    # the affine path is actually exercised.
    gamma = 1.0 + 0.1 * jax.random.normal(kg, (C,), dtype=jnp.float32)
    beta = 0.1 * jax.random.normal(kb, (C,), dtype=jnp.float32)

    out = batchnorm2d_pallas(x, gamma, beta)
    out = jax.block_until_ready(out)

    ref = batchnorm2d_ref(x, gamma, beta)
    assert out.shape == (N, C, H, W)
    assert jnp.allclose(out, ref, atol=1e-4, rtol=1e-4), "mismatch vs reference"

    print("KERNEL_OK")
</pallas_src>

<mosaic_0001>
module attributes {stable_mosaic.version = 11 : i64} {
  func.func @_bn_kernel(%arg0: i32, %arg1: memref<1x384x49xf32, #tpu.memory_space<vmem>>, %arg2: memref<1x384x1xf32, #tpu.memory_space<vmem>>, %arg3: memref<1x384x1xf32, #tpu.memory_space<vmem>>, %arg4: memref<1x384x49xf32, #tpu.memory_space<vmem>>) attributes {dimension_semantics = [#tpu.dimension_semantics<arbitrary>], iteration_bounds = array<i64: 1>, scalar_prefetch = 0 : i64, scratch_operands = 0 : i64, tpu.core_type = #tpu.core_type<tc>, window_params = [{pipeline_mode = #tpu.pipeline_mode<synchronous>, transform_indices = @transform_0, window_bounds = array<i64: 1, 384, 49>}, {pipeline_mode = #tpu.pipeline_mode<synchronous>, transform_indices = @transform_1, window_bounds = array<i64: 1, 384, 1>}, {pipeline_mode = #tpu.pipeline_mode<synchronous>, transform_indices = @transform_2, window_bounds = array<i64: 1, 384, 1>}, {pipeline_mode = #tpu.pipeline_mode<synchronous>, transform_indices = @transform_3, window_bounds = array<i64: 1, 384, 49>}]} {
    %c0 = arith.constant 0 : index
    %c0_0 = arith.constant 0 : index
    %c0_1 = arith.constant 0 : index
    %0 = vector.load %arg1[%c0, %c0_0, %c0_1] : memref<1x384x49xf32, #tpu.memory_space<vmem>>, vector<1x384x49xf32>
    %cst = arith.constant dense<0.000000e+00> : vector<1x384xf32>
    %1 = vector.multi_reduction <add>, %0, %cst [2] : vector<1x384x49xf32> to vector<1x384xf32>
    %2 = vector.shape_cast %1 : vector<1x384xf32> to vector<1x384x1xf32>
    %3 = arith.mulf %0, %0 : vector<1x384x49xf32>
    %cst_2 = arith.constant dense<0.000000e+00> : vector<1x384xf32>
    %4 = vector.multi_reduction <add>, %3, %cst_2 [2] : vector<1x384x49xf32> to vector<1x384xf32>
    %5 = vector.shape_cast %4 : vector<1x384xf32> to vector<1x384x1xf32>
    %cst_3 = arith.constant 0.0204081628 : f32
    %6 = vector.broadcast %cst_3 : f32 to vector<1x384x1xf32>
    %7 = arith.mulf %2, %6 : vector<1x384x1xf32>
    %cst_4 = arith.constant 0.0204081628 : f32
    %8 = vector.broadcast %cst_4 : f32 to vector<1x384x1xf32>
    %9 = arith.mulf %5, %8 : vector<1x384x1xf32>
    %10 = arith.mulf %7, %7 : vector<1x384x1xf32>
    %11 = arith.subf %9, %10 : vector<1x384x1xf32>
    %cst_5 = arith.constant 0.000000e+00 : f32
    %12 = vector.broadcast %cst_5 : f32 to vector<1x384x1xf32>
    %13 = arith.maximumf %11, %12 : vector<1x384x1xf32>
    %cst_6 = arith.constant 1.000000e-03 : f32
    %14 = vector.broadcast %cst_6 : f32 to vector<1x384x1xf32>
    %15 = arith.addf %13, %14 : vector<1x384x1xf32>
    %16 = math.rsqrt %15 : vector<1x384x1xf32>
    %c0_7 = arith.constant 0 : index
    %c0_8 = arith.constant 0 : index
    %c0_9 = arith.constant 0 : index
    %17 = vector.load %arg2[%c0_7, %c0_8, %c0_9] : memref<1x384x1xf32, #tpu.memory_space<vmem>>, vector<1x384x1xf32>
    %18 = arith.mulf %16, %17 : vector<1x384x1xf32>
    %c0_10 = arith.constant 0 : index
    %c0_11 = arith.constant 0 : index
    %c0_12 = arith.constant 0 : index
    %19 = vector.load %arg3[%c0_10, %c0_11, %c0_12] : memref<1x384x1xf32, #tpu.memory_space<vmem>>, vector<1x384x1xf32>
    %20 = arith.mulf %7, %18 : vector<1x384x1xf32>
    %21 = arith.subf %19, %20 : vector<1x384x1xf32>
    %22 = vector.broadcast %18 : vector<1x384x1xf32> to vector<1x384x49xf32>
    %23 = arith.mulf %0, %22 : vector<1x384x49xf32>
    %24 = vector.broadcast %21 : vector<1x384x1xf32> to vector<1x384x49xf32>
    %25 = arith.addf %23, %24 : vector<1x384x49xf32>
    %c0_13 = arith.constant 0 : index
    %c0_14 = arith.constant 0 : index
    %c0_15 = arith.constant 0 : index
    %26 = vector.load %arg4[%c0_13, %c0_14, %c0_15] : memref<1x384x49xf32, #tpu.memory_space<vmem>>, vector<1x384x49xf32>
    tpu.vector_store %arg4[%c0_13, %c0_14, %c0_15], %25 {strides = array<i32>} : memref<1x384x49xf32, #tpu.memory_space<vmem>>, vector<1x384x49xf32>,
    return
  }
  func.func @transform_0(%arg0: i32) -> (i32, i32, i32) {
    %c0_i32 = arith.constant 0 : i32
    %c0_i32_0 = arith.constant 0 : i32
    %c0_i32_1 = arith.constant 0 : i32
    %c0_i32_2 = arith.constant 0 : i32
    return %c0_i32, %c0_i32_0, %c0_i32_1 : i32, i32, i32
  }
  func.func @transform_1(%arg0: i32) -> (i32, i32, i32) {
    %c0_i32 = arith.constant 0 : i32
    %c0_i32_0 = arith.constant 0 : i32
    %c0_i32_1 = arith.constant 0 : i32
    %c0_i32_2 = arith.constant 0 : i32
    return %c0_i32, %c0_i32_0, %c0_i32_1 : i32, i32, i32
  }
  func.func @transform_2(%arg0: i32) -> (i32, i32, i32) {
    %c0_i32 = arith.constant 0 : i32
    %c0_i32_0 = arith.constant 0 : i32
    %c0_i32_1 = arith.constant 0 : i32
    %c0_i32_2 = arith.constant 0 : i32
    return %c0_i32, %c0_i32_0, %c0_i32_1 : i32, i32, i32
  }
  func.func @transform_3(%arg0: i32) -> (i32, i32, i32) {
    %c0_i32 = arith.constant 0 : i32
    %c0_i32_0 = arith.constant 0 : i32
    %c0_i32_1 = arith.constant 0 : i32
    %c0_i32_2 = arith.constant 0 : i32
    return %c0_i32, %c0_i32_0, %c0_i32_1 : i32, i32, i32
  }
}

</mosaic_0001>

<bundles_post_ra>
// kernel: tpu_custom_call.1
= control target key start
LH: loop header
LB: loop body
LE: loop exit
PB: predicated region body
PF: predicated region fallthrough
CT: control target
= control target key end

     0   :  { %vm62_vm0 = vcmask 400384   ;;  %s3595_s0 = inlined_call_operand.vmem [shape: f32[1,384,49], index: 0, kind: input, shape index: {}]   ;;  %s3596_s1 = inlined_call_operand.vmem [shape: f32[1,384,1], index: 1, kind: input, shape index: {}]   ;;  %s3597_s2 = inlined_call_operand.vmem [shape: f32[1,384,1], index: 2, kind: input, shape index: {}]   ;;  %s3598_s3 = inlined_call_operand.vmem [shape: f32[1,384,49], index: 3, kind: output, shape index: {}]  }
   0x1   :  { %v1774_v0 = vld [vmem:[%s3595_s0 + $0x10] sm:$0xff]  ;;  %v1779_v1 = vld [vmem:[%s3595_s0] sm:$0xff]  ;;  %v1784_v2 = vld [vmem:[%s3595_s0 + $0x18] sm:$0xff] }
   0x2   :  { %v69_v3 = vsel %vm62_vm0, %v1774_v0, 0.0  ;;  %v63_v4 = vsel %vm62_vm0, %v1779_v1, 0.0  ;;  %v1793_v5 = vld [vmem:[%s3595_s0 + $0x8] sm:$0xff]  ;;  %v72_v6 = vsel %vm62_vm0, %v1784_v2, 0.0  ;;  %v1807_v9 = vld [vmem:[%s3595_s0 + $0x20] sm:$0xff]  ;;  %v1816_v12 = vld [vmem:[%s3595_s0 + $0x38] sm:$0xff] }
   0x3   :  { %70 = vadd.xlane.f32.xlu1 %v69_v3  ;;  %64 = vadd.xlane.f32.xlu0 %v63_v4  ;;  %v66_v7 = vsel %vm62_vm0, %v1793_v5, 0.0  ;;  %v1802_v8 = vld [vmem:[%s3595_s0 + $0x28] sm:$0xff]  ;;  %v75_v11 = vsel %vm62_vm0, %v1807_v9, 0.0  ;;  %v1821_v13 = vld [vmem:[%s3595_s0 + $0x30] sm:$0xff]  ;;  %v84_v14 = vsel %vm62_vm0, %v1816_v12, 0.0  ;;  %v1835_v17 = vld [vmem:[%s3595_s0 + $0x40] sm:$0xff] }
   0x4   :  { %v78_v10 = vsel %vm62_vm0, %v1802_v8, 0.0  ;;  %v81_v15 = vsel %vm62_vm0, %v1821_v13, 0.0  ;;  %v1830_v16 = vld [vmem:[%s3595_s0 + $0x48] sm:$0xff]  ;;  %v87_v19 = vsel %vm62_vm0, %v1835_v17, 0.0  ;;  %v1844_v20 = vld [vmem:[%s3595_s0 + $0x58] sm:$0xff]  ;;  %v1849_v21 = vld [vmem:[%s3595_s0 + $0x50] sm:$0xff] }
   0x5   :  { %v90_v18 = vsel %vm62_vm0, %v1830_v16, 0.0  ;;  %v96_v22 = vsel %vm62_vm0, %v1844_v20, 0.0  ;;  %v93_v23 = vsel %vm62_vm0, %v1849_v21, 0.0  ;;  %v1858_v24 = vld [vmem:[%s3595_s0 + $0x68] sm:$0xff]  ;;  %v1863_v25 = vld [vmem:[%s3595_s0 + $0x60] sm:$0xff]  ;;  %v1872_v28 = vld [vmem:[%s3595_s0 + $0x78] sm:$0xff] }
   0x6   :  { %v102_v26 = vsel %vm62_vm0, %v1858_v24, 0.0  ;;  %v99_v27 = vsel %vm62_vm0, %v1863_v25, 0.0  ;;  %v1877_v29 = vld [vmem:[%s3595_s0 + $0x70] sm:$0xff]  ;;  %v108_v30 = vsel %vm62_vm0, %v1872_v28, 0.0  ;;  %v1886_v32 = vld [vmem:[%s3595_s0 + $0x88] sm:$0xff]  ;;  %v1891_v33 = vld [vmem:[%s3595_s0 + $0x80] sm:$0xff] }
   0x7   :  { %73 = vadd.xlane.f32.xlu1 %v72_v6  ;;  %67 = vadd.xlane.f32.xlu0 %v66_v7  ;;  %v105_v31 = vsel %vm62_vm0, %v1877_v29, 0.0  ;;  %v114_v34 = vsel %vm62_vm0, %v1886_v32, 0.0  ;;  %v111_v35 = vsel %vm62_vm0, %v1891_v33, 0.0  ;;  %v1900_v36 = vld [vmem:[%s3595_s0 + $0x98] sm:$0xff]  ;;  %v1905_v37 = vld [vmem:[%s3595_s0 + $0x90] sm:$0xff]  ;;  %v1914_v40 = vld [vmem:[%s3595_s0 + $0xa8] sm:$0xff] }
   0x8   :  { %v120_v38 = vsel %vm62_vm0, %v1900_v36, 0.0  ;;  %v117_v39 = vsel %vm62_vm0, %v1905_v37, 0.0  ;;  %v1919_v41 = vld [vmem:[%s3595_s0 + $0xa0] sm:$0xff]  ;;  %v126_v42 = vsel %vm62_vm0, %v1914_v40, 0.0  ;;  %v1928_v44 = vld [vmem:[%s3595_s0 + $0xb8] sm:$0xff]  ;;  %v1933_v45 = vld [vmem:[%s3595_s0 + $0xb0] sm:$0xff] }
   0x9   :  { %v123_v43 = vsel %vm62_vm0, %v1919_v41, 0.0  ;;  %v132_v46 = vsel %vm62_vm0, %v1928_v44, 0.0  ;;  %v129_v47 = vsel %vm62_vm0, %v1933_v45, 0.0  ;;  %v1942_v48 = vld [vmem:[%s3595_s0 + $0xc8] sm:$0xff]  ;;  %v1947_v49 = vld [vmem:[%s3595_s0 + $0xc0] sm:$0xff]  ;;  %v1956_v52 = vld [vmem:[%s3595_s0 + $0xd8] sm:$0xff] }
   0xa   :  { %v138_v50 = vsel %vm62_vm0, %v1942_v48, 0.0  ;;  %v135_v51 = vsel %vm62_vm0, %v1947_v49, 0.0  ;;  %v1961_v53 = vld [vmem:[%s3595_s0 + $0xd0] sm:$0xff]  ;;  %v144_v54 = vsel %vm62_vm0, %v1956_v52, 0.0  ;;  %v1970_v56 = vld [vmem:[%s3595_s0 + $0xe8] sm:$0xff]  ;;  %v1975_v57 = vld [vmem:[%s3595_s0 + $0xe0] sm:$0xff] }
   0xb   :  { %79 = vadd.xlane.f32.xlu1 %v78_v10  ;;  %76 = vadd.xlane.f32.xlu0 %v75_v11  ;;  %v141_v55 = vsel %vm62_vm0, %v1961_v53, 0.0  ;;  %v150_v58 = vsel %vm62_vm0, %v1970_v56, 0.0  ;;  %v147_v59 = vsel %vm62_vm0, %v1975_v57, 0.0  ;;  %v1984_v60 = vld [vmem:[%s3595_s0 + $0xf8] sm:$0xff]  ;;  %v1989_v61 = vld [vmem:[%s3595_s0 + $0xf0] sm:$0xff]  ;;  %v1998_v3 = vld [vmem:[%s3595_s0 + $0x108] sm:$0xff] }
   0xc   :  { %v156_v62 = vsel %vm62_vm0, %v1984_v60, 0.0  ;;  %v153_v63 = vsel %vm62_vm0, %v1989_v61, 0.0  ;;  %v2003_v4 = vld [vmem:[%s3595_s0 + $0x100] sm:$0xff]  ;;  %v162_v6 = vsel %vm62_vm0, %v1998_v3, 0.0  ;;  %v2012_v10 = vld [vmem:[%s3595_s0 + $0x118] sm:$0xff]  ;;  %v2017_v11 = vld [vmem:[%s3595_s0 + $0x110] sm:$0xff] }
   0xd   :  { %v159_v7 = vsel %vm62_vm0, %v2003_v4, 0.0 }
   0xf   :  { %85 = vadd.xlane.f32.xlu1 %v84_v14  ;;  %82 = vadd.xlane.f32.xlu0 %v81_v15  ;;  %v168_v14 = vsel %vm62_vm0, %v2012_v10, 0.0  ;;  %v165_v15 = vsel %vm62_vm0, %v2017_v11, 0.0 }
  0x13   :  { %91 = vadd.xlane.f32.xlu1 %v90_v18  ;;  %88 = vadd.xlane.f32.xlu0 %v87_v19  ;;  %v2026_v18 = vld [vmem:[%s3595_s0 + $0x128] sm:$0xff]  ;;  %v2031_v19 = vld [vmem:[%s3595_s0 + $0x120] sm:$0xff] }
  0x17   :  { %97 = vadd.xlane.f32.xlu1 %v96_v22  ;;  %94 = vadd.xlane.f32.xlu0 %v93_v23  ;;  %v174_v22 = vsel %vm62_vm0, %v2026_v18, 0.0  ;;  %v171_v23 = vsel %vm62_vm0, %v2031_v19, 0.0 }
  0x1b   :  { %103 = vadd.xlane.f32.xlu1 %v102_v26  ;;  %100 = vadd.xlane.f32.xlu0 %v99_v27  ;;  %v2040_v26 = vld [vmem:[%s3595_s0 + $0x138] sm:$0xff]  ;;  %v2045_v27 = vld [vmem:[%s3595_s0 + $0x130] sm:$0xff] }
  0x1f   :  { %109 = vadd.xlane.f32.xlu1 %v108_v30  ;;  %106 = vadd.xlane.f32.xlu0 %v105_v31  ;;  %v180_v30 = vsel %vm62_vm0, %v2040_v26, 0.0  ;;  %v177_v31 = vsel %vm62_vm0, %v2045_v27, 0.0 }
  0x23   :  { %115 = vadd.xlane.f32.xlu1 %v114_v34  ;;  %112 = vadd.xlane.f32.xlu0 %v111_v35  ;;  %v2054_v34 = vld [vmem:[%s3595_s0 + $0x148] sm:$0xff]  ;;  %v2059_v35 = vld [vmem:[%s3595_s0 + $0x140] sm:$0xff] }
  0x27   :  { %121 = vadd.xlane.f32.xlu1 %v120_v38  ;;  %118 = vadd.xlane.f32.xlu0 %v117_v39  ;;  %v186_v38 = vsel %vm62_vm0, %v2054_v34, 0.0  ;;  %v183_v39 = vsel %vm62_vm0, %v2059_v35, 0.0 }
  0x2b   :  { %127 = vadd.xlane.f32.xlu1 %v126_v42  ;;  %124 = vadd.xlane.f32.xlu0 %v123_v43  ;;  %v2068_v42 = vld [vmem:[%s3595_s0 + $0x158] sm:$0xff]  ;;  %v2073_v43 = vld [vmem:[%s3595_s0 + $0x150] sm:$0xff] }
  0x2f   :  { %133 = vadd.xlane.f32.xlu1 %v132_v46  ;;  %130 = vadd.xlane.f32.xlu0 %v129_v47  ;;  %v192_v46 = vsel %vm62_vm0, %v2068_v42, 0.0  ;;  %v189_v47 = vsel %vm62_vm0, %v2073_v43, 0.0 }
  0x33   :  { %139 = vadd.xlane.f32.xlu1 %v138_v50  ;;  %136 = vadd.xlane.f32.xlu0 %v135_v51  ;;  %v2082_v50 = vld [vmem:[%s3595_s0 + $0x168] sm:$0xff]  ;;  %v2087_v51 = vld [vmem:[%s3595_s0 + $0x160] sm:$0xff] }
  0x37   :  { %145 = vadd.xlane.f32.xlu1 %v144_v54  ;;  %142 = vadd.xlane.f32.xlu0 %v141_v55  ;;  %v198_v54 = vsel %vm62_vm0, %v2082_v50, 0.0  ;;  %v195_v55 = vsel %vm62_vm0, %v2087_v51, 0.0 }
  0x3b   :  { %151 = vadd.xlane.f32.xlu1 %v150_v58  ;;  %148 = vadd.xlane.f32.xlu0 %v147_v59  ;;  %v2096_v58 = vld [vmem:[%s3595_s0 + $0x178] sm:$0xff]  ;;  %v2101_v59 = vld [vmem:[%s3595_s0 + $0x170] sm:$0xff] }
  0x3f   :  { %157 = vadd.xlane.f32.xlu1 %v156_v62  ;;  %154 = vadd.xlane.f32.xlu0 %v153_v63  ;;  %v204_v62 = vsel %vm62_vm0, %v2096_v58, 0.0  ;;  %v201_v63 = vsel %vm62_vm0, %v2101_v59, 0.0 }
  0x43   :  { %163 = vadd.xlane.f32.xlu1 %v162_v6  ;;  %160 = vadd.xlane.f32.xlu0 %v159_v7  ;;  %v208_v6 = vmul.f32 %v1793_v5, %v1793_v5  ;;  %v207_v7 = vmul.f32 %v1779_v1, %v1779_v1  ;;  %v212_v1 = vmul.f32 %v1802_v8, %v1802_v8 }
  0x47   :  { %169 = vadd.xlane.f32.xlu1 %v168_v14  ;;  %166 = vadd.xlane.f32.xlu0 %v165_v15  ;;  %v258_v14 = vsel %vm62_vm0, %v208_v6, 0.0  ;;  %v255_v15 = vsel %vm62_vm0, %v207_v7, 0.0  ;;  %v221_v7 = vmul.f32 %v1877_v29, %v1877_v29  ;;  %v226_v29 = vmul.f32 %v1900_v36, %v1900_v36 }
  0x4b   :  { %175 = vadd.xlane.f32.xlu1 %v174_v22  ;;  %172 = vadd.xlane.f32.xlu0 %v171_v23  ;;  %v210_v22 = vmul.f32 %v1784_v2, %v1784_v2  ;;  %v209_v23 = vmul.f32 %v1774_v0, %v1774_v0  ;;  %v214_v0 = vmul.f32 %v1816_v12, %v1816_v12 }
  0x4d   :  { %v261_v5 = vsel %vm62_vm0, %v209_v23, 0.0  ;;  %v225_v23 = vmul.f32 %v1905_v37, %v1905_v37 }
  0x4f   :  { %181 = vadd.xlane.f32.xlu1 %v180_v30  ;;  %178 = vadd.xlane.f32.xlu0 %v177_v31  ;;  %v264_v30 = vsel %vm62_vm0, %v210_v22, 0.0  ;;  %v211_v31 = vmul.f32 %v1807_v9, %v1807_v9  ;;  %v216_v9 = vmul.f32 %v1830_v16, %v1830_v16 }
  0x51   :  { %v267_v2 = vsel %vm62_vm0, %v211_v31, 0.0  ;;  %v230_v31 = vmul.f32 %v1928_v44, %v1928_v44 }
  0x53   :  { %187 = vadd.xlane.f32.xlu1 %v186_v38  ;;  %184 = vadd.xlane.f32.xlu0 %v183_v39  ;;  %v270_v38 = vsel %vm62_vm0, %v212_v1, 0.0  ;;  %v213_v39 = vmul.f32 %v1821_v13, %v1821_v13  ;;  %v218_v13 = vmul.f32 %v1844_v20, %v1844_v20  ;;  %v1750_v1 = vmov 0  }
  0x54   :  { %1605 = vset.pattern.permute.xlu1 %v1750_v1  ;;  %1604 = vset.pattern.permute.xlu0 %v1750_v1 }
  0x55   :  { %v273_v8 = vsel %vm62_vm0, %v213_v39, 0.0 }
  0x57   :  { %193 = vadd.xlane.f32.xlu1 %v192_v46  ;;  %190 = vadd.xlane.f32.xlu0 %v189_v47  ;;  %v276_v46 = vsel %vm62_vm0, %v214_v0, 0.0  ;;  %v215_v47 = vmul.f32 %v1835_v17, %v1835_v17  ;;  %v220_v17 = vmul.f32 %v1858_v24, %v1858_v24  ;;  %v297_v24 = vsel %vm62_vm0, %v221_v7, 0.0 }
  0x58   :  { %v231_v0 = vmul.f32 %v1947_v49, %v1947_v49 }
  0x59   :  { %v279_v12 = vsel %vm62_vm0, %v215_v47, 0.0  ;;  %v294_v6 = vsel %vm62_vm0, %v220_v17, 0.0  ;;  %v237_v17 = vmul.f32 %v1989_v61, %v1989_v61 }
  0x5b   :  { %199 = vadd.xlane.f32.xlu1 %v198_v54  ;;  %196 = vadd.xlane.f32.xlu0 %v195_v55  ;;  %v282_v54 = vsel %vm62_vm0, %v216_v9, 0.0  ;;  %v217_v55 = vmul.f32 %v1849_v21, %v1849_v21  ;;  %v222_v21 = vmul.f32 %v1872_v28, %v1872_v28  ;;  %v233_v9 = vmul.f32 %v1961_v53, %v1961_v53 }
  0x5d   :  { %v285_v16 = vsel %vm62_vm0, %v217_v55, 0.0 }
  0x5f   :  { %205 = vadd.xlane.f32.xlu1 %v204_v62  ;;  %202 = vadd.xlane.f32.xlu0 %v201_v63  ;;  %v288_v62 = vsel %vm62_vm0, %v218_v13, 0.0  ;;  %v219_v63 = vmul.f32 %v1863_v25, %v1863_v25  ;;  %v224_v25 = vmul.f32 %v1886_v32, %v1886_v32  ;;  %v309_v32 = vsel %vm62_vm0, %v225_v23, 0.0 }
  0x60   :  { %v235_v13 = vmul.f32 %v1975_v57, %v1975_v57 }
  0x61   :  { %v291_v20 = vsel %vm62_vm0, %v219_v63, 0.0  ;;  %v306_v22 = vsel %vm62_vm0, %v224_v25, 0.0  ;;  %v241_v25 = vmul.f32 %v2017_v11, %v2017_v11 }
  0x63   :  { %259 = vadd.xlane.f32.xlu1 %v258_v14  ;;  %256 = vadd.xlane.f32.xlu0 %v255_v15  ;;  %v300_v14 = vsel %vm62_vm0, %v222_v21, 0.0  ;;  %v223_v15 = vmul.f32 %v1891_v33, %v1891_v33  ;;  %v228_v33 = vmul.f32 %v1914_v40, %v1914_v40  ;;  %v324_v40 = vsel %vm62_vm0, %v230_v31, 0.0 }
  0x64   :  { %v239_v21 = vmul.f32 %v2003_v4, %v2003_v4 }
  0x65   :  { %v303_v28 = vsel %vm62_vm0, %v223_v15, 0.0  ;;  %v318_v36 = vsel %vm62_vm0, %v228_v33, 0.0  ;;  %v245_v33 = vmul.f32 %v2045_v27, %v2045_v27 }
  0x67   :  { %265 = vadd.xlane.f32.xlu1 %v264_v30  ;;  %262 = vadd.xlane.f32.xlu0 %v261_v5  ;;  %v312_v30 = vsel %vm62_vm0, %v226_v29, 0.0  ;;  %v227_v5 = vmul.f32 %v1919_v41, %v1919_v41  ;;  %v243_v29 = vmul.f32 %v2031_v19, %v2031_v19  ;;  %v369_v1 = vsel %vm62_vm0, %v245_v33, 0.0 }
  0x69   :  { %v315_v37 = vsel %vm62_vm0, %v227_v5, 0.0 }
  0x6b   :  { %271 = vadd.xlane.f32.xlu1 %v270_v38  ;;  %268 = vadd.xlane.f32.xlu0 %v267_v2  ;;  %v229_v38 = vmul.f32 %v1933_v45, %v1933_v45  ;;  %v232_v2 = vmul.f32 %v1942_v48, %v1942_v48 }
  0x6d   :  { %v321_v41 = vsel %vm62_vm0, %v229_v38, 0.0  ;;  %v330_v45 = vsel %vm62_vm0, %v232_v2, 0.0 }
  0x6f   :  { %277 = vadd.xlane.f32.xlu1 %v276_v46  ;;  %274 = vadd.xlane.f32.xlu0 %v273_v8  ;;  %v327_v46 = vsel %vm62_vm0, %v231_v0, 0.0  ;;  %v234_v8 = vmul.f32 %v1956_v52, %v1956_v52 }
  0x71   :  { %v336_v47 = vsel %vm62_vm0, %v234_v8, 0.0 }
  0x73   :  { %283 = vadd.xlane.f32.xlu1 %v282_v54  ;;  %280 = vadd.xlane.f32.xlu0 %v279_v12  ;;  %v333_v54 = vsel %vm62_vm0, %v233_v9, 0.0  ;;  %v236_v12 = vmul.f32 %v1970_v56, %v1970_v56 }
  0x75   :  { %v342_v55 = vsel %vm62_vm0, %v236_v12, 0.0 }
  0x77   :  { %289 = vadd.xlane.f32.xlu1 %v288_v62  ;;  %286 = vadd.xlane.f32.xlu0 %v285_v16  ;;  %v339_v62 = vsel %vm62_vm0, %v235_v13, 0.0  ;;  %v238_v16 = vmul.f32 %v1984_v60, %v1984_v60 }
  0x79   :  { %v348_v63 = vsel %vm62_vm0, %v238_v16, 0.0 }
  0x7b   :  { %295 = vadd.xlane.f32.xlu1 %v294_v6  ;;  %292 = vadd.xlane.f32.xlu0 %v291_v20  ;;  %v345_v6 = vsel %vm62_vm0, %v237_v17, 0.0  ;;  %v240_v20 = vmul.f32 %v1998_v3, %v1998_v3 }
  0x7d   :  { %v354_v7 = vsel %vm62_vm0, %v240_v20, 0.0 }
  0x7f   :  { %301 = vadd.xlane.f32.xlu1 %v300_v14  ;;  %298 = vadd.xlane.f32.xlu0 %v297_v24  ;;  %v351_v14 = vsel %vm62_vm0, %v239_v21, 0.0  ;;  %v242_v24 = vmul.f32 %v2012_v10, %v2012_v10 }
  0x81   :  { %v360_v15 = vsel %vm62_vm0, %v242_v24, 0.0 }
  0x83   :  { %307 = vadd.xlane.f32.xlu1 %v306_v22  ;;  %304 = vadd.xlane.f32.xlu0 %v303_v28  ;;  %v357_v22 = vsel %vm62_vm0, %v241_v25, 0.0  ;;  %v244_v28 = vmul.f32 %v2026_v18, %v2026_v18 }
  0x85   :  { %v366_v23 = vsel %vm62_vm0, %v244_v28, 0.0 }
  0x87   :  { %313 = vadd.xlane.f32.xlu1 %v312_v30  ;;  %310 = vadd.xlane.f32.xlu0 %v309_v32  ;;  %v363_v30 = vsel %vm62_vm0, %v243_v29, 0.0  ;;  %v246_v32 = vmul.f32 %v2040_v26, %v2040_v26 }
  0x89   :  { %v372_v5 = vsel %vm62_vm0, %v246_v32, 0.0 }
  0x8b   :  { %319 = vadd.xlane.f32.xlu1 %v318_v36  ;;  %316 = vadd.xlane.f32.xlu0 %v315_v37  ;;  %v248_v36 = vmul.f32 %v2054_v34, %v2054_v34  ;;  %v247_v37 = vmul.f32 %v2059_v35, %v2059_v35 }
  0x8d   :  { %v378_v31 = vsel %vm62_vm0, %v248_v36, 0.0  ;;  %v375_v38 = vsel %vm62_vm0, %v247_v37, 0.0 }
  0x8f   :  { %325 = vadd.xlane.f32.xlu1 %v324_v40  ;;  %322 = vadd.xlane.f32.xlu0 %v321_v41  ;;  %v250_v40 = vmul.f32 %v2068_v42, %v2068_v42  ;;  %v249_v41 = vmul.f32 %v2073_v43, %v2073_v43 }
  0x90   :  { %v2183_v39 = vpop.xlane.xlu1 %70  ;;  %v2185_v44 = vpop.xlane.xlu0 %64 }
  0x91   :  { %v384_v2 = vsel %vm62_vm0, %v250_v40, 0.0  ;;  %v381_v0 = vsel %vm62_vm0, %v249_v41, 0.0  ;;  %v2348_v36 = vmul.f32 0.020408163, %v2185_v44 }
  0x93   :  { %331 = vadd.xlane.f32.xlu1 %v330_v45  ;;  %328 = vadd.xlane.f32.xlu0 %v327_v46  ;;  %v252_v45 = vmul.f32 %v2082_v50, %v2082_v50  ;;  %v251_v46 = vmul.f32 %v2087_v51, %v2087_v51  ;;  %3642 = vst [vmem:[#allocation3_spill] sm:$0xff] %v2348_v36 }
  0x94   :  { %v2193_v48 = vpop.xlane.xlu1 %73  ;;  %v2195_v49 = vpop.xlane.xlu0 %67 }
  0x95   :  { %v390_v8 = vsel %vm62_vm0, %v252_v45, 0.0  ;;  %v387_v9 = vsel %vm62_vm0, %v251_v46, 0.0  ;;  %v2351_v37 = vmul.f32 0.020408163, %v2195_v49 }
  0x97   :  { %337 = vadd.xlane.f32.xlu1 %v336_v47  ;;  %334 = vadd.xlane.f32.xlu0 %v333_v54  ;;  %v254_v47 = vmul.f32 %v2096_v58, %v2096_v58  ;;  %v253_v54 = vmul.f32 %v2101_v59, %v2101_v59  ;;  %3643 = vst [vmem:[#allocation4_spill] sm:$0xff] %v2351_v37 }
  0x98   :  { %v2203_v52 = vpop.xlane.xlu1 %79  ;;  %v2205_v53 = vpop.xlane.xlu0 %76 }
  0x99   :  { %v396_v12 = vsel %vm62_vm0, %v254_v47, 0.0  ;;  %v393_v13 = vsel %vm62_vm0, %v253_v54, 0.0 }
  0x9b   :  { %343 = vadd.xlane.f32.xlu1 %v342_v55  ;;  %340 = vadd.xlane.f32.xlu0 %v339_v62 }
  0x9c   :  { %v2213_v56 = vpop.xlane.xlu1 %85  ;;  %v2215_v57 = vpop.xlane.xlu0 %82 }
  0x9f   :  { %349 = vadd.xlane.f32.xlu1 %v348_v63  ;;  %346 = vadd.xlane.f32.xlu0 %v345_v6 }
  0xa0   :  { %v2223_v60 = vpop.xlane.xlu1 %91  ;;  %v2225_v61 = vpop.xlane.xlu0 %88 }
  0xa3   :  { %355 = vadd.xlane.f32.xlu1 %v354_v7  ;;  %352 = vadd.xlane.f32.xlu0 %v351_v14 }
  0xa4   :  { %v2233_v3 = vpop.xlane.xlu1 %97  ;;  %v2235_v4 = vpop.xlane.xlu0 %94 }
  0xa7   :  { %361 = vadd.xlane.f32.xlu1 %v360_v15  ;;  %358 = vadd.xlane.f32.xlu0 %v357_v22 }
  0xa8   :  { %v2243_v10 = vpop.xlane.xlu1 %103  ;;  %v2245_v11 = vpop.xlane.xlu0 %100 }
  0xab   :  { %367 = vadd.xlane.f32.xlu1 %v366_v23  ;;  %364 = vadd.xlane.f32.xlu0 %v363_v30 }
  0xac   :  { %v2253_v18 = vpop.xlane.xlu1 %109  ;;  %v2255_v19 = vpop.xlane.xlu0 %106 }
  0xaf   :  { %373 = vadd.xlane.f32.xlu1 %v372_v5  ;;  %370 = vadd.xlane.f32.xlu0 %v369_v1 }
  0xb0   :  { %v2263_v26 = vpop.xlane.xlu1 %115  ;;  %v2265_v27 = vpop.xlane.xlu0 %112 }
  0xb3   :  { %379 = vadd.xlane.f32.xlu1 %v378_v31  ;;  %376 = vadd.xlane.f32.xlu0 %v375_v38  ;;  %v2354_v31 = vmul.f32 0.020408163, %v2183_v39  ;;  %v2357_v38 = vmul.f32 0.020408163, %v2193_v48  ;;  %v2368_v48 = vmul.f32 0.020408163, %v2203_v52 }
  0xb4   :  { %v2273_v34 = vpop.xlane.xlu1 %121  ;;  %v2275_v35 = vpop.xlane.xlu0 %118 }
  0xb5   :  { %3644 = vst [vmem:[#allocation5_spill] sm:$0xff] %v2354_v31  ;;  %3645 = vst [vmem:[#allocation6_spill] sm:$0xff] %v2357_v38  ;;  %v497_v49 = vmul.f32 %v2354_v31, %v2354_v31  ;;  %v498_v39 = vmul.f32 %v2357_v38, %v2357_v38 }
  0xb7   :  { %385 = vadd.xlane.f32.xlu1 %v384_v2  ;;  %382 = vadd.xlane.f32.xlu0 %v381_v0  ;;  %v495_v2 = vmul.f32 %v2348_v36, %v2348_v36  ;;  %v496_v0 = vmul.f32 %v2351_v37, %v2351_v37 }
  0xb8   :  { %v2283_v42 = vpop.xlane.xlu1 %127  ;;  %v2285_v43 = vpop.xlane.xlu0 %124 }
  0xbb   :  { %391 = vadd.xlane.f32.xlu1 %v390_v8  ;;  %388 = vadd.xlane.f32.xlu0 %v387_v9 }
  0xbc   :  { %v2293_v50 = vpop.xlane.xlu1 %133  ;;  %v2295_v51 = vpop.xlane.xlu0 %130 }
  0xbf   :  { %397 = vadd.xlane.f32.xlu1 %v396_v12  ;;  %394 = vadd.xlane.f32.xlu0 %v393_v13 }
  0xc0   :  { %v2299_v55 = vpop.xlane.xlu1 %139  ;;  %v2301_v62 = vpop.xlane.xlu0 %136 }
  0xc4   :  { %v2303_v58 = vpop.xlane.xlu1 %145  ;;  %v2305_v16 = vpop.xlane.xlu0 %142 }
  0xc8   :  { %v2307_v59 = vpop.xlane.xlu1 %151  ;;  %v2309_v17 = vpop.xlane.xlu0 %148 }
  0xcc   :  { %v2311_v63 = vpop.xlane.xlu1 %157  ;;  %v2313_v6 = vpop.xlane.xlu0 %154 }
  0xd0   :  { %v2315_v20 = vpop.xlane.xlu1 %163  ;;  %v2317_v21 = vpop.xlane.xlu0 %160 }
  0xd4   :  { %v2319_v7 = vpop.xlane.xlu1 %169  ;;  %v2321_v14 = vpop.xlane.xlu0 %166 }
  0xd8   :  { %v2323_v24 = vpop.xlane.xlu1 %175  ;;  %v2325_v25 = vpop.xlane.xlu0 %172 }
  0xdc   :  { %v2327_v15 = vpop.xlane.xlu1 %181  ;;  %v2329_v22 = vpop.xlane.xlu0 %178 }
  0xe0   :  { %v2331_v28 = vpop.xlane.xlu1 %187  ;;  %v2333_v29 = vpop.xlane.xlu0 %184 }
  0xe4   :  { %v2335_v23 = vpop.xlane.xlu1 %193  ;;  %v2337_v30 = vpop.xlane.xlu0 %190 }
  0xe8   :  { %v2339_v32 = vpop.xlane.xlu1 %199  ;;  %v2341_v33 = vpop.xlane.xlu0 %196 }
  0xec   :  { %v2343_v5 = vpop.xlane.xlu1 %205  ;;  %v2345_v1 = vpop.xlane.xlu0 %202 }
  0xed   :  { %3641 = vst [vmem:[#allocation2_spill] sm:$0xff] %v2345_v1 }
  0xf0   :  { %v260_v40 = vpop.xlane.xlu1 %259  ;;  %v257_v41 = vpop.xlane.xlu0 %256 }
  0xf1   :  { %v448_v45 = vmul.f32 0.020408163, %v260_v40  ;;  %v447_v44 = vmul.f32 0.020408163, %v257_v41  ;;  %v2371_v40 = vmul.f32 0.020408163, %v2205_v53 }
  0xf3   :  { %v544_v46 = vsub.f32 %v448_v45, %v496_v0  ;;  %v543_v8 = vsub.f32 %v447_v44, %v495_v2  ;;  %3646 = vst [vmem:[#allocation7_spill] sm:$0xff] %v2371_v40  ;;  %v500_v44 = vmul.f32 %v2368_v48, %v2368_v48 }
  0xf4   :  { %v266_v9 = vpop.xlane.xlu1 %265  ;;  %v263_v47 = vpop.xlane.xlu0 %262 }
  0xf5   :  { %v592_v54 = vmax.f32 %v544_v46, 0.0  ;;  %v591_v12 = vmax.f32 %v543_v8, 0.0  ;;  %v450_v13 = vmul.f32 0.020408163, %v266_v9  ;;  %v449_v36 = vmul.f32 0.020408163, %v263_v47 }
  0xf6   :  { %v499_v46 = vmul.f32 %v2371_v40, %v2371_v40  ;;  %v2378_v8 = vmul.f32 0.020408163, %v2215_v57 }
  0xf7   :  { %v640_v41 = vadd.f32 0.001, %v592_v54  ;;  %v639_v2 = vadd.f32 0.001, %v591_v12  ;;  %v546_v0 = vsub.f32 %v450_v13, %v498_v39  ;;  %v545_v45 = vsub.f32 %v449_v36, %v497_v49 }
  0xf8   :  { %v272_v31 = vpop.xlane.xlu1 %271  ;;  %v269_v38 = vpop.xlane.xlu0 %268  ;;  %3647 = vst [vmem:[#allocation8_spill] sm:$0xff] %v2378_v8  ;;  %v2381_v36 = vmul.f32 0.020408163, %v2213_v56  ;;  %v2384_v12 = vmul.f32 0.020408163, %v2223_v60 }
  0xf9   :  { %1606 = vrsqrt.f32 %v640_v41  ;;  %v594_v52 = vmax.f32 %v546_v0, 0.0  ;;  %v593_v37 = vmax.f32 %v545_v45, 0.0  ;;  %v452_v1 = vmul.f32 0.020408163, %v272_v31 }
  0xfa   :  { %1608 = vrsqrt.f32 %v639_v2  ;;  %v451_v53 = vmul.f32 0.020408163, %v269_v38  ;;  %v501_v41 = vmul.f32 %v2378_v8, %v2378_v8  ;;  %v2389_v38 = vmul.f32 0.020408163, %v2233_v3 }
  0xfb   :  { %v641_v9 = vadd.f32 0.001, %v593_v37  ;;  %v548_v49 = vsub.f32 %v452_v1, %v500_v44  ;;  %v642_v31 = vadd.f32 0.001, %v594_v52  ;;  %v502_v56 = vmul.f32 %v2381_v36, %v2381_v36 }
  0xfc   :  { %v547_v39 = vsub.f32 %v451_v53, %v499_v46  ;;  %v278_v47 = vpop.xlane.xlu1 %277  ;;  %v275_v54 = vpop.xlane.xlu0 %274  ;;  %3648 = vst [vmem:[#allocation9_spill] sm:$0xff] %v2389_v38  ;;  %v504_v60 = vmul.f32 %v2384_v12, %v2384_v12  ;;  %v736_v46 = vld [vmem:[%s3596_s1 + $0x8] sm:$0xff]  ;;  %v2399_v3 = vmul.f32 0.020408163, %v2225_v61  ;;  %v2409_v61 = vmul.f32 0.020408163, %v2243_v10 }
  0xfd   :  { %v453_v13 = vmul.f32 0.020408163, %v275_v54  ;;  %1610 = vrsqrt.f32 %v641_v9  ;;  %v454_v37 = vmul.f32 0.020408163, %v278_v47  ;;  %v596_v1 = vmax.f32 %v548_v49, 0.0  ;;  %v735_v47 = vld [vmem:[%s3596_s1] sm:$0xff] }
  0xfe   :  { %v595_v57 = vmax.f32 %v547_v39, 0.0  ;;  %1612 = vrsqrt.f32 %v642_v31  ;;  %3649 = vst [vmem:[#allocation10_spill] sm:$0xff] %v2399_v3  ;;  %v506_v9 = vmul.f32 %v2389_v38, %v2389_v38 }
  0xff   :  { %v549_v2 = vsub.f32 %v453_v13, %v501_v41  ;;  %v550_v49 = vsub.f32 %v454_v37, %v502_v56  ;;  %v644_v31 = vadd.f32 0.001, %v596_v1  ;;  %v503_v37 = vmul.f32 %v2399_v3, %v2399_v3 }
 0x100   :  { %v284_v0 = vpop.xlane.xlu1 %283  ;;  %v281_v45 = vpop.xlane.xlu0 %280  ;;  %v643_v44 = vadd.f32 0.001, %v595_v57  ;;  %v2414_v56 = vmul.f32 0.020408163, %v2235_v4 }
 0x101   :  { %v456_v52 = vmul.f32 0.020408163, %v284_v0  ;;  %v597_v13 = vmax.f32 %v549_v2, 0.0  ;;  %v455_v41 = vmul.f32 0.020408163, %v281_v45  ;;  %v598_v45 = vmax.f32 %v550_v49, 0.0 }
 0x102   :  { %1614 = vrsqrt.f32 %v643_v44  ;;  %3650 = vst [vmem:[#allocation11_spill] sm:$0xff] %v2414_v56  ;;  %v2420_v2 = vmul.f32 0.020408163, %v2253_v18  ;;  %v737_v44 = vld [vmem:[%s3596_s1 + $0x10] sm:$0xff]  ;;  %v508_v18 = vmul.f32 %v2409_v61, %v2409_v61 }
 0x103   :  { %v1607_v53 = vpop.eup %1606  ;;  %v552_v39 = vsub.f32 %v456_v52, %v504_v60  ;;  %1616 = vrsqrt.f32 %v644_v31 }
 0x104   :  { %v1609_v54 = vpop.eup %1608  ;;  %v290_v57 = vpop.xlane.xlu1 %289  ;;  %v2406_v8 = vmul.f32 %v1607_v53, %v736_v46  ;;  %v645_v46 = vadd.f32 0.001, %v597_v13  ;;  %v551_v53 = vsub.f32 %v455_v41, %v503_v37  ;;  %v510_v41 = vmul.f32 %v2420_v2, %v2420_v2 }
 0x105   :  { %v287_v0 = vpop.xlane.xlu0 %286  ;;  %v600_v40 = vmax.f32 %v552_v39, 0.0  ;;  %v458_v38 = vmul.f32 0.020408163, %v290_v57  ;;  %v2417_v1 = vmul.f32 %v1609_v54, %v735_v47  ;;  %v2434_v54 = vmul.f32 0.020408163, %v2255_v19 }
 0x106   :  { %982 = vperm.xlu1 %1605, %v2406_v8   ;;  %v457_v4 = vmul.f32 0.020408163, %v287_v0  ;;  %v646_v57 = vadd.f32 0.001, %v598_v45 }
 0x107   :  { %v648_v60 = vadd.f32 0.001, %v600_v40  ;;  %v554_v10 = vsub.f32 %v458_v38, %v506_v9  ;;  %v1611_v52 = vpop.eup %1610  ;;  %977 = vperm.xlu0 %1604, %v2417_v1   ;;  %v505_v38 = vmul.f32 %v2414_v56, %v2414_v56  ;;  %v2431_v9 = vmul.f32 0.020408163, %v2245_v11  ;;  %3652 = vst [vmem:[#allocation13_spill] sm:$0xff] %v2434_v54 }
 0x108   :  { %v296_v39 = vpop.xlane.xlu1 %295  ;;  %v2436_v31 = vmul.f32 %v1611_v52, %v737_v44  ;;  %v1613_v13 = vpop.eup %1612  ;;  %v2445_v52 = vmul.f32 0.020408163, %v2263_v26 }
 0x109   :  { %v293_v47 = vpop.xlane.xlu0 %292  ;;  %1618 = vrsqrt.f32 %v648_v60  ;;  %v602_v49 = vmax.f32 %v554_v10, 0.0  ;;  %v460_v40 = vmul.f32 0.020408163, %v296_v39  ;;  %3651 = vst [vmem:[#allocation12_spill] sm:$0xff] %v2431_v9  ;;  %v738_v60 = vld [vmem:[%s3596_s1 + $0x18] sm:$0xff]  ;;  %v599_v10 = vmax.f32 %v551_v53, 0.0 }
 0x10a   :  { %1620 = vrsqrt.f32 %v645_v46  ;;  %v553_v11 = vsub.f32 %v457_v4, %v505_v38  ;;  %v459_v39 = vmul.f32 0.020408163, %v293_v47  ;;  %987 = vperm.xlu1 %1605, %v2436_v31   ;;  %3653 = vst [vmem:[#allocation14_spill] sm:$0xff] %v2445_v52  ;;  %v2453_v46 = vmul.f32 0.020408163, %v2273_v34 }
 0x10b   :  { %v650_v0 = vadd.f32 0.001, %v602_v49  ;;  %v556_v37 = vsub.f32 %v460_v40, %v508_v18  ;;  %v507_v18 = vmul.f32 %v2431_v9, %v2431_v9  ;;  %v2450_v49 = vmul.f32 0.020408163, %v2265_v27  ;;  %v740_v9 = vld [vmem:[%s3596_s1 + $0x28] sm:$0xff] }
 0x10c   :  { %v302_v19 = vpop.xlane.xlu1 %301  ;;  %3655 = vst [vmem:[#allocation16_spill] sm:$0xff] %v2453_v46  ;;  %v2455_v53 = vmul.f32 %v1613_v13, %v738_v60  ;;  %v1615_v4 = vpop.eup %1614  ;;  %v509_v47 = vmul.f32 %v2434_v54, %v2434_v54  ;;  %v601_v27 = vmax.f32 %v553_v11, 0.0  ;;  %v512_v60 = vmul.f32 %v2445_v52, %v2445_v52 }
 0x10d   :  { %v299_v44 = vpop.xlane.xlu0 %298  ;;  %1622 = vrsqrt.f32 %v650_v0  ;;  %v604_v56 = vmax.f32 %v556_v37, 0.0  ;;  %v462_v45 = vmul.f32 0.020408163, %v302_v19  ;;  %3654 = vst [vmem:[#allocation15_spill] sm:$0xff] %v2450_v49  ;;  %v739_v0 = vld [vmem:[%s3596_s1 + $0x20] sm:$0xff]  ;;  %v555_v19 = vsub.f32 %v459_v39, %v507_v18 }
 0x10e   :  { %v461_v38 = vmul.f32 0.020408163, %v299_v44  ;;  %1624 = vrsqrt.f32 %v646_v57  ;;  %v647_v37 = vadd.f32 0.001, %v599_v10  ;;  %992 = vperm.xlu1 %1605, %v2455_v53   ;;  %v1617_v44 = vpop.eup %1616  ;;  %v511_v57 = vmul.f32 %v2450_v49, %v2450_v49 }
 0x10f   :  { %v652_v26 = vadd.f32 0.001, %v604_v56  ;;  %v558_v40 = vsub.f32 %v462_v45, %v510_v41  ;;  %v744_v41 = vld [vmem:[%s3596_s1 + $0x48] sm:$0xff]  ;;  %v514_v10 = vmul.f32 %v2453_v46, %v2453_v46  ;;  %v2473_v11 = vmul.f32 0.020408163, %v2275_v35 }
 0x110   :  { %v308_v34 = vpop.xlane.xlu1 %307  ;;  %v2475_v39 = vmul.f32 %v1615_v4, %v739_v0  ;;  %v649_v52 = vadd.f32 0.001, %v601_v27  ;;  %v603_v49 = vmax.f32 %v555_v19, 0.0  ;;  %v2484_v4 = vmul.f32 0.020408163, %v2283_v42 }
 0x111   :  { %v305_v13 = vpop.xlane.xlu0 %304  ;;  %1626 = vrsqrt.f32 %v652_v26  ;;  %v606_v54 = vmax.f32 %v558_v40, 0.0  ;;  %v464_v56 = vmul.f32 0.020408163, %v308_v34  ;;  %3656 = vst [vmem:[#allocation17_spill] sm:$0xff] %v2473_v11  ;;  %v557_v26 = vsub.f32 %v461_v38, %v509_v47  ;;  %v746_v38 = vld [vmem:[%s3596_s1 + $0x58] sm:$0xff] }
 0x112   :  { %v463_v34 = vmul.f32 0.020408163, %v305_v13  ;;  %1628 = vrsqrt.f32 %v647_v37  ;;  %997 = vperm.xlu1 %1605, %v2475_v39   ;;  %3657 = vst [vmem:[#allocation18_spill] sm:$0xff] %v2484_v4  ;;  %v513_v37 = vmul.f32 %v2473_v11, %v2473_v11  ;;  %v2492_v27 = vmul.f32 0.020408163, %v2285_v43 }
 0x113   :  { %v1619_v45 = vpop.eup %1618  ;;  %v654_v18 = vadd.f32 0.001, %v606_v54  ;;  %v560_v40 = vsub.f32 %v464_v56, %v512_v60  ;;  %v2495_v19 = vmul.f32 0.020408163, %v2293_v50  ;;  %v2498_v42 = vmul.f32 %v1617_v44, %v740_v9 }
 0x114   :  { %v314_v46 = vpop.xlane.xlu1 %313  ;;  %v2481_v35 = vmul.f32 %v1619_v45, %v744_v41  ;;  %v1621_v0 = vpop.eup %1620  ;;  %3658 = vst [vmem:[#allocation19_spill] sm:$0xff] %v2492_v27  ;;  %v559_v56 = vsub.f32 %v463_v34, %v511_v57  ;;  %v741_v45 = vld [vmem:[%s3596_s1 + $0x30] sm:$0xff]  ;;  %v516_v9 = vmul.f32 %v2484_v4, %v2484_v4 }
 0x115   :  { %v311_v3 = vpop.xlane.xlu0 %310  ;;  %1630 = vrsqrt.f32 %v654_v18  ;;  %v608_v54 = vmax.f32 %v560_v40, 0.0  ;;  %v466_v47 = vmul.f32 0.020408163, %v314_v46  ;;  %3659 = vst [vmem:[#allocation20_spill] sm:$0xff] %v2495_v19  ;;  %v605_v46 = vmax.f32 %v557_v26, 0.0 }
 0x116   :  { %1022 = vperm.xlu0 %1604, %v2481_v35   ;;  %1632 = vrsqrt.f32 %v649_v52  ;;  %v651_v18 = vadd.f32 0.001, %v603_v49  ;;  %v465_v43 = vmul.f32 0.020408163, %v311_v3  ;;  %1002 = vperm.xlu1 %1605, %v2498_v42   ;;  %v515_v3 = vmul.f32 %v2492_v27, %v2492_v27 }
 0x117   :  { %v1623_v13 = vpop.eup %1622  ;;  %v656_v60 = vadd.f32 0.001, %v608_v54  ;;  %v562_v41 = vsub.f32 %v466_v47, %v514_v10  ;;  %v748_v10 = vld [vmem:[%s3596_s1 + $0x68] sm:$0xff]  ;;  %v518_v52 = vmul.f32 %v2495_v19, %v2495_v19  ;;  %v2516_v49 = vmul.f32 0.020408163, %v2295_v51 }
 0x118   :  { %v320_v50 = vpop.xlane.xlu1 %319  ;;  %v2504_v11 = vmul.f32 %v1623_v13, %v746_v38  ;;  %v1625_v26 = vpop.eup %1624  ;;  %v2519_v34 = vmul.f32 %v1621_v0, %v741_v45  ;;  %v653_v47 = vadd.f32 0.001, %v605_v46  ;;  %v607_v38 = vmax.f32 %v559_v56, 0.0  ;;  %v750_v45 = vld [vmem:[%s3596_s1 + $0x78] sm:$0xff] }
 0x119   :  { %v317_v40 = vpop.xlane.xlu0 %316  ;;  %1634 = vrsqrt.f32 %v656_v60  ;;  %v610_v44 = vmax.f32 %v562_v41, 0.0  ;;  %v468_v57 = vmul.f32 0.020408163, %v320_v50  ;;  %3660 = vst [vmem:[#allocation21_spill] sm:$0xff] %v2516_v49  ;;  %v742_v41 = vld [vmem:[%s3596_s1 + $0x38] sm:$0xff]  ;;  %v561_v50 = vsub.f32 %v465_v43, %v513_v37 }
 0x11a   :  { %1032 = vperm.xlu0 %1604, %v2504_v11   ;;  %1636 = vrsqrt.f32 %v651_v18  ;;  %v467_v27 = vmul.f32 0.020408163, %v317_v40  ;;  %1007 = vperm.xlu1 %1605, %v2519_v34   ;;  %v2528_v0 = vmul.f32 0.020408163, %v2299_v55  ;;  %v517_v37 = vmul.f32 %v2516_v49, %v2516_v49 }
 0x11b   :  { %v1627_v54 = vpop.eup %1626  ;;  %v658_v13 = vadd.f32 0.001, %v610_v44  ;;  %v564_v60 = vsub.f32 %v468_v57, %v516_v9  ;;  %v2536_v18 = vmul.f32 0.020408163, %v2301_v62  ;;  %v2539_v43 = vmul.f32 0.020408163, %v2303_v58 }
 0x11c   :  { %v326_v51 = vpop.xlane.xlu1 %325  ;;  %v2525_v4 = vmul.f32 %v1627_v54, %v748_v10  ;;  %3661 = vst [vmem:[#allocation22_spill] sm:$0xff] %v2528_v0  ;;  %v1629_v9 = vpop.eup %1628  ;;  %v2542_v55 = vmul.f32 %v1625_v26, %v742_v41  ;;  %v655_v44 = vadd.f32 0.001, %v607_v38  ;;  %v743_v54 = vld [vmem:[%s3596_s1 + $0x40] sm:$0xff]  ;;  %v520_v26 = vmul.f32 %v2528_v0, %v2528_v0 }
 0x11d   :  { %v323_v19 = vpop.xlane.xlu0 %322  ;;  %1638 = vrsqrt.f32 %v658_v13  ;;  %v612_v46 = vmax.f32 %v564_v60, 0.0  ;;  %v470_v56 = vmul.f32 0.020408163, %v326_v51  ;;  %3662 = vst [vmem:[#allocation23_spill] sm:$0xff] %v2536_v18  ;;  %3663 = vst [vmem:[#allocation24_spill] sm:$0xff] %v2539_v43  ;;  %v609_v13 = vmax.f32 %v561_v50, 0.0 }
 0x11e   :  { %1042 = vperm.xlu0 %1604, %v2525_v4   ;;  %1640 = vrsqrt.f32 %v653_v47  ;;  %v563_v60 = vsub.f32 %v467_v27, %v515_v3  ;;  %v469_v62 = vmul.f32 0.020408163, %v323_v19  ;;  %1012 = vperm.xlu1 %1605, %v2542_v55   ;;  %v519_v27 = vmul.f32 %v2536_v18, %v2536_v18 }
 0x11f   :  { %v1631_v40 = vpop.eup %1630  ;;  %v660_v57 = vadd.f32 0.001, %v612_v46  ;;  %v566_v10 = vsub.f32 %v470_v56, %v518_v52  ;;  %v752_v52 = vld [vmem:[%s3596_s1 + $0x88] sm:$0xff]  ;;  %v522_v19 = vmul.f32 %v2539_v43, %v2539_v43  ;;  %v2560_v3 = vmul.f32 0.020408163, %v2305_v16 }
 0x120   :  { %v332_v58 = vpop.xlane.xlu1 %331  ;;  %v2548_v49 = vmul.f32 %v1631_v40, %v750_v45  ;;  %v1633_v41 = vpop.eup %1632  ;;  %v2563_v50 = vmul.f32 %v1629_v9, %v743_v54  ;;  %v565_v18 = vsub.f32 %v469_v62, %v517_v37  ;;  %v2572_v9 = vmul.f32 0.020408163, %v2307_v59 }
 0x121   :  { %v329_v51 = vpop.xlane.xlu0 %328  ;;  %1642 = vrsqrt.f32 %v660_v57  ;;  %v614_v47 = vmax.f32 %v566_v10, 0.0  ;;  %v472_v38 = vmul.f32 0.020408163, %v332_v58  ;;  %3664 = vst [vmem:[#allocation25_spill] sm:$0xff] %v2560_v3  ;;  %v745_v57 = vld [vmem:[%s3596_s1 + $0x50] sm:$0xff]  ;;  %v611_v58 = vmax.f32 %v563_v60, 0.0 }
 0x122   :  { %1052 = vperm.xlu0 %1604, %v2548_v49   ;;  %1644 = vrsqrt.f32 %v655_v44  ;;  %v471_v40 = vmul.f32 0.020408163, %v329_v51  ;;  %v657_v10 = vadd.f32 0.001, %v609_v13  ;;  %1017 = vperm.xlu1 %1605, %v2563_v50   ;;  %3665 = vst [vmem:[#allocation26_spill] sm:$0xff] %v2572_v9  ;;  %v754_v51 = vld [vmem:[%s3596_s1 + $0x98] sm:$0xff]  ;;  %v521_v37 = vmul.f32 %v2560_v3, %v2560_v3 }
 0x123   :  { %v1635_v46 = vpop.eup %1634  ;;  %v662_v56 = vadd.f32 0.001, %v614_v47  ;;  %v568_v45 = vsub.f32 %v472_v38, %v520_v26  ;;  %v2580_v13 = vmul.f32 0.020408163, %v2309_v17  ;;  %v2583_v60 = vmul.f32 0.020408163, %v2311_v63 }
 0x124   :  { %v338_v16 = vpop.xlane.xlu1 %337  ;;  %v2569_v0 = vmul.f32 %v1635_v46, %v752_v52  ;;  %v1637_v26 = vpop.eup %1636  ;;  %v2586_v59 = vmul.f32 %v1633_v41, %v745_v57  ;;  %v567_v38 = vsub.f32 %v471_v40, %v519_v27  ;;  %v613_v17 = vmax.f32 %v565_v18, 0.0 }
 0x125   :  { %v335_v43 = vpop.xlane.xlu0 %334  ;;  %1646 = vrsqrt.f32 %v662_v56  ;;  %v616_v44 = vmax.f32 %v568_v45, 0.0  ;;  %v474_v54 = vmul.f32 0.020408163, %v338_v16  ;;  %3666 = vst [vmem:[#allocation27_spill] sm:$0xff] %v2580_v13  ;;  %3667 = vst [vmem:[#allocation28_spill] sm:$0xff] %v2583_v60  ;;  %v747_v56 = vld [vmem:[%s3596_s1 + $0x60] sm:$0xff]  ;;  %v524_v57 = vmul.f32 %v2572_v9, %v2572_v9 }
 0x126   :  { %1062 = vperm.xlu0 %1604, %v2569_v0   ;;  %v473_v46 = vmul.f32 0.020408163, %v335_v43  ;;  %1648 = vrsqrt.f32 %v657_v10  ;;  %v659_v45 = vadd.f32 0.001, %v611_v58  ;;  %1027 = vperm.xlu1 %1605, %v2586_v59   ;;  %v523_v18 = vmul.f32 %v2580_v13, %v2580_v13 }
 0x127   :  { %v1639_v62 = vpop.eup %1638  ;;  %v664_v47 = vadd.f32 0.001, %v616_v44  ;;  %v570_v52 = vsub.f32 %v474_v54, %v522_v19  ;;  %v756_v19 = vld [vmem:[%s3596_s1 + $0xa8] sm:$0xff]  ;;  %v526_v40 = vmul.f32 %v2583_v60, %v2583_v60  ;;  %v2604_v10 = vmul.f32 0.020408163, %v2313_v6 }
 0x128   :  { %v344_v63 = vpop.xlane.xlu1 %343  ;;  %v2592_v3 = vmul.f32 %v1639_v62, %v754_v51  ;;  %v1641_v41 = vpop.eup %1640  ;;  %v2607_v58 = vmul.f32 %v1637_v26, %v747_v56  ;;  %v615_v54 = vmax.f32 %v567_v38, 0.0  ;;  %v569_v62 = vsub.f32 %v473_v46, %v521_v37  ;;  %v758_v46 = vld [vmem:[%s3596_s1 + $0xb8] sm:$0xff] }
 0x129   :  { %v341_v16 = vpop.xlane.xlu0 %340  ;;  %1650 = vrsqrt.f32 %v664_v47  ;;  %v618_v27 = vmax.f32 %v570_v52, 0.0  ;;  %v476_v43 = vmul.f32 0.020408163, %v344_v63  ;;  %3668 = vst [vmem:[#allocation29_spill] sm:$0xff] %v2604_v10  ;;  %v749_v52 = vld [vmem:[%s3596_s1 + $0x70] sm:$0xff] }
 0x12a   :  { %1072 = vperm.xlu0 %1604, %v2592_v3   ;;  %1652 = vrsqrt.f32 %v659_v45  ;;  %v661_v63 = vadd.f32 0.001, %v613_v17  ;;  %v475_v13 = vmul.f32 0.020408163, %v341_v16  ;;  %1037 = vperm.xlu1 %1605, %v2607_v58   ;;  %v2616_v56 = vmul.f32 0.020408163, %v2315_v20 }
 0x12b   :  { %v1643_v44 = vpop.eup %1642  ;;  %v666_v51 = vadd.f32 0.001, %v618_v27  ;;  %v572_v47 = vsub.f32 %v476_v43, %v524_v57  ;;  %v525_v45 = vmul.f32 %v2604_v10, %v2604_v10  ;;  %v2624_v17 = vmul.f32 0.020408163, %v2317_v21 }
 0x12c   :  { %v350_v6 = vpop.xlane.xlu1 %349  ;;  %v2613_v9 = vmul.f32 %v1643_v44, %v756_v19  ;;  %v1645_v26 = vpop.eup %1644  ;;  %3669 = vst [vmem:[#allocation30_spill] sm:$0xff] %v2616_v56  ;;  %v2627_v16 = vmul.f32 0.020408163, %v2319_v7  ;;  %v2630_v20 = vmul.f32 %v1641_v41, %v749_v52  ;;  %v663_v27 = vadd.f32 0.001, %v615_v54 }
 0x12d   :  { %v347_v60 = vpop.xlane.xlu0 %346  ;;  %1654 = vrsqrt.f32 %v666_v51  ;;  %v620_v37 = vmax.f32 %v572_v47, 0.0  ;;  %v478_v38 = vmul.f32 0.020408163, %v350_v6  ;;  %3670 = vst [vmem:[#allocation31_spill] sm:$0xff] %v2624_v17  ;;  %v617_v43 = vmax.f32 %v569_v62, 0.0  ;;  %v751_v51 = vld [vmem:[%s3596_s1 + $0x80] sm:$0xff] }
 0x12e   :  { %3671 = vst [vmem:[#allocation32_spill] sm:$0xff] %v2627_v16  ;;  %1082 = vperm.xlu0 %1604, %v2613_v9   ;;  %1656 = vrsqrt.f32 %v661_v63  ;;  %v571_v47 = vsub.f32 %v475_v13, %v523_v18  ;;  %v477_v21 = vmul.f32 0.020408163, %v347_v60  ;;  %1047 = vperm.xlu1 %1605, %v2630_v20   ;;  %v528_v41 = vmul.f32 %v2616_v56, %v2616_v56 }
 0x12f   :  { %v1647_v57 = vpop.eup %1646  ;;  %v668_v19 = vadd.f32 0.001, %v620_v37  ;;  %v574_v44 = vsub.f32 %v478_v38, %v526_v40  ;;  %v760_v40 = vld [vmem:[%s3596_s1 + $0xc8] sm:$0xff]  ;;  %v527_v13 = vmul.f32 %v2624_v17, %v2624_v17  ;;  %v530_v60 = vmul.f32 %v2627_v16, %v2627_v16 }
 0x130   :  { %v356_v7 = vpop.xlane.xlu1 %355  ;;  %v2636_v10 = vmul.f32 %v1647_v57, %v758_v46  ;;  %v1649_v52 = vpop.eup %1648  ;;  %v2648_v18 = vmul.f32 0.020408163, %v2321_v14  ;;  %v2651_v63 = vmul.f32 %v1645_v26, %v751_v51  ;;  %v665_v38 = vadd.f32 0.001, %v617_v43  ;;  %v762_v51 = vld [vmem:[%s3596_s1 + $0xd8] sm:$0xff] }
 0x131   :  { %v353_v6 = vpop.xlane.xlu0 %352  ;;  %1658 = vrsqrt.f32 %v668_v19  ;;  %v622_v54 = vmax.f32 %v574_v44, 0.0  ;;  %v480_v62 = vmul.f32 0.020408163, %v356_v7  ;;  %v753_v19 = vld [vmem:[%s3596_s1 + $0x90] sm:$0xff]  ;;  %v619_v44 = vmax.f32 %v571_v47, 0.0 }
 0x132   :  { %3672 = vst [vmem:[#allocation33_spill] sm:$0xff] %v2648_v18  ;;  %1092 = vperm.xlu0 %1604, %v2636_v10   ;;  %1660 = vrsqrt.f32 %v663_v27  ;;  %v573_v7 = vsub.f32 %v477_v21, %v525_v45  ;;  %v479_v17 = vmul.f32 0.020408163, %v353_v6  ;;  %1057 = vperm.xlu1 %1605, %v2651_v63   ;;  %v2660_v26 = vmul.f32 0.020408163, %v2323_v24 }
 0x133   :  { %v1651_v37 = vpop.eup %1650  ;;  %v670_v46 = vadd.f32 0.001, %v622_v54  ;;  %v576_v57 = vsub.f32 %v480_v62, %v528_v41  ;;  %v529_v45 = vmul.f32 %v2648_v18, %v2648_v18  ;;  %v2668_v47 = vmul.f32 0.020408163, %v2325_v25 }
 0x134   :  { %v362_v14 = vpop.xlane.xlu1 %361  ;;  %v2657_v56 = vmul.f32 %v1651_v37, %v760_v40  ;;  %3673 = vst [vmem:[#allocation34_spill] sm:$0xff] %v2660_v26  ;;  %v1653_v41 = vpop.eup %1652  ;;  %v2671_v21 = vmul.f32 0.020408163, %v2327_v15  ;;  %v2674_v24 = vmul.f32 %v1649_v52, %v753_v19  ;;  %v755_v37 = vld [vmem:[%s3596_s1 + $0xa0] sm:$0xff]  ;;  %v575_v25 = vsub.f32 %v479_v17, %v527_v13 }
 0x135   :  { %v359_v16 = vpop.xlane.xlu0 %358  ;;  %1662 = vrsqrt.f32 %v670_v46  ;;  %v624_v27 = vmax.f32 %v576_v57, 0.0  ;;  %v482_v43 = vmul.f32 0.020408163, %v362_v14  ;;  %3674 = vst [vmem:[#allocation35_spill] sm:$0xff] %v2668_v47  ;;  %v667_v46 = vadd.f32 0.001, %v619_v44 }
 0x136   :  { %3675 = vst [vmem:[#allocation36_spill] sm:$0xff] %v2671_v21  ;;  %1102 = vperm.xlu0 %1604, %v2657_v56   ;;  %1664 = vrsqrt.f32 %v665_v38  ;;  %v481_v40 = vmul.f32 0.020408163, %v359_v16  ;;  %v621_v57 = vmax.f32 %v573_v7, 0.0  ;;  %1067 = vperm.xlu1 %1605, %v2674_v24   ;;  %v532_v52 = vmul.f32 %v2660_v26, %v2660_v26  ;;  %v764_v16 = vld [vmem:[%s3596_s1 + $0xe8] sm:$0xff] }
 0x137   :  { %v1655_v6 = vpop.eup %1654  ;;  %v672_v54 = vadd.f32 0.001, %v624_v27  ;;  %v578_v62 = vsub.f32 %v482_v43, %v530_v60  ;;  %v531_v17 = vmul.f32 %v2668_v47, %v2668_v47  ;;  %v534_v13 = vmul.f32 %v2671_v21, %v2671_v21 }
 0x138   :  { %v368_v15 = vpop.xlane.xlu1 %367  ;;  %v2680_v18 = vmul.f32 %v1655_v6, %v762_v51  ;;  %v1657_v19 = vpop.eup %1656  ;;  %v2692_v44 = vmul.f32 %v1653_v41, %v755_v37  ;;  %v577_v43 = vsub.f32 %v481_v40, %v529_v45  ;;  %v2701_v37 = vmul.f32 0.020408163, %v2331_v28 }
 0x139   :  { %v365_v14 = vpop.xlane.xlu0 %364  ;;  %1666 = vrsqrt.f32 %v672_v54  ;;  %v626_v38 = vmax.f32 %v578_v62, 0.0  ;;  %v484_v60 = vmul.f32 0.020408163, %v368_v15  ;;  %v757_v54 = vld [vmem:[%s3596_s1 + $0xb0] sm:$0xff]  ;;  %v669_v62 = vadd.f32 0.001, %v621_v57 }
 0x13a   :  { %1112 = vperm.xlu0 %1604, %v2680_v18   ;;  %v483_v6 = vmul.f32 0.020408163, %v365_v14  ;;  %1668 = vrsqrt.f32 %v667_v46  ;;  %v623_v15 = vmax.f32 %v575_v25, 0.0  ;;  %1077 = vperm.xlu1 %1605, %v2692_v44   ;;  %3676 = vst [vmem:[#allocation37_spill] sm:$0xff] %v2701_v37  ;;  %v766_v14 = vld [vmem:[%s3596_s1 + $0xf8] sm:$0xff]  ;;  %v2713_v25 = vmul.f32 %v1657_v19, %v757_v54 }
 0x13b   :  { %v1659_v7 = vpop.eup %1658  ;;  %v674_v27 = vadd.f32 0.001, %v626_v38  ;;  %v580_v51 = vsub.f32 %v484_v60, %v532_v52  ;;  %v2707_v46 = vmul.f32 0.020408163, %v2329_v22  ;;  %v2710_v57 = vmul.f32 0.020408163, %v2335_v23 }
 0x13c   :  { %v374_v47 = vpop.xlane.xlu1 %373  ;;  %v2698_v26 = vmul.f32 %v1659_v7, %v764_v16  ;;  %v1661_v41 = vpop.eup %1660  ;;  %v625_v28 = vmax.f32 %v577_v43, 0.0  ;;  %v579_v60 = vsub.f32 %v483_v6, %v531_v17  ;;  %v671_v7 = vadd.f32 0.001, %v623_v15  ;;  %v768_v6 = vld [vmem:[%s3596_s1 + $0x108] sm:$0xff] }
 0x13d   :  { %v371_v21 = vpop.xlane.xlu0 %370  ;;  %1670 = vrsqrt.f32 %v674_v27  ;;  %v628_v45 = vmax.f32 %v580_v51, 0.0  ;;  %v486_v40 = vmul.f32 0.020408163, %v374_v47  ;;  %3677 = vst [vmem:[#allocation38_spill] sm:$0xff] %v2707_v46  ;;  %3678 = vst [vmem:[#allocation39_spill] sm:$0xff] %v2710_v57  ;;  %v759_v47 = vld [vmem:[%s3596_s1 + $0xc0] sm:$0xff]  ;;  %v536_v43 = vmul.f32 %v2701_v37, %v2701_v37 }
 0x13e   :  { %1122 = vperm.xlu0 %1604, %v2698_v26   ;;  %1672 = vrsqrt.f32 %v669_v62  ;;  %v485_v22 = vmul.f32 0.020408163, %v371_v21  ;;  %1087 = vperm.xlu1 %1605, %v2713_v25   ;;  %v533_v21 = vmul.f32 %v2707_v46, %v2707_v46  ;;  %v2729_v54 = vmul.f32 0.020408163, %v2333_v29 }
 0x13f   :  { %v1663_v52 = vpop.eup %1662  ;;  %v676_v38 = vadd.f32 0.001, %v628_v45  ;;  %v582_v16 = vsub.f32 %v486_v40, %v534_v13  ;;  %v538_v62 = vmul.f32 %v2710_v57, %v2710_v57  ;;  %v2734_v15 = vmul.f32 %v1661_v41, %v759_v47  ;;  %v770_v47 = vld [vmem:[%s3596_s1 + $0x118] sm:$0xff] }
 0x140   :  { %v380_v23 = vpop.xlane.xlu1 %379  ;;  %v2719_v51 = vmul.f32 %v1663_v52, %v766_v14  ;;  %v1665_v19 = vpop.eup %1664  ;;  %3679 = vst [vmem:[#allocation40_spill] sm:$0xff] %v2729_v54  ;;  %v673_v40 = vadd.f32 0.001, %v625_v28  ;;  %v627_v14 = vmax.f32 %v579_v60, 0.0  ;;  %v2743_v41 = vmul.f32 0.020408163, %v2339_v32 }
 0x141   :  { %v377_v27 = vpop.xlane.xlu0 %376  ;;  %1674 = vrsqrt.f32 %v676_v38  ;;  %v630_v17 = vmax.f32 %v582_v16, 0.0  ;;  %v488_v13 = vmul.f32 0.020408163, %v380_v23  ;;  %v761_v16 = vld [vmem:[%s3596_s1 + $0xd0] sm:$0xff]  ;;  %v581_v23 = vsub.f32 %v485_v22, %v533_v21  ;;  %v763_v21 = vld [vmem:[%s3596_s1 + $0xe0] sm:$0xff] }
 0x142   :  { %1132 = vperm.xlu0 %1604, %v2719_v51   ;;  %1676 = vrsqrt.f32 %v671_v7  ;;  %v487_v29 = vmul.f32 0.020408163, %v377_v27  ;;  %1097 = vperm.xlu1 %1605, %v2734_v15   ;;  %3680 = vst [vmem:[#allocation41_spill] sm:$0xff] %v2743_v41  ;;  %v535_v7 = vmul.f32 %v2729_v54, %v2729_v54  ;;  %v2751_v22 = vmul.f32 0.020408163, %v2337_v30 }
 0x143   :  { %v1667_v45 = vpop.eup %1666  ;;  %v678_v52 = vadd.f32 0.001, %v630_v17  ;;  %v584_v38 = vsub.f32 %v488_v13, %v536_v43  ;;  %v2754_v27 = vmul.f32 0.020408163, %v2343_v5  ;;  %v2757_v32 = vmul.f32 %v1665_v19, %v761_v16 }
 0x144   :  { %v386_v46 = vpop.xlane.xlu1 %385  ;;  %v2740_v37 = vmul.f32 %v1667_v45, %v768_v6  ;;  %v1669_v43 = vpop.eup %1668  ;;  %3681 = vst [vmem:[#allocation42_spill] sm:$0xff] %v2751_v22  ;;  %v629_v45 = vmax.f32 %v581_v23, 0.0  ;;  %v540_v19 = vmul.f32 %v2743_v41, %v2743_v41  ;;  %v2773_v23 = vmul.f32 0.020408163, %v2341_v33 }
 0x145   :  { %v383_v57 = vpop.xlane.xlu0 %382  ;;  %1678 = vrsqrt.f32 %v678_v52  ;;  %v632_v28 = vmax.f32 %v584_v38, 0.0  ;;  %v490_v60 = vmul.f32 0.020408163, %v386_v46  ;;  %3682 = vst [vmem:[#allocation43_spill] sm:$0xff] %v2754_v27  ;;  %v675_v46 = vadd.f32 0.001, %v627_v14 }
 0x146   :  { %1142 = vperm.xlu0 %1604, %v2740_v37   ;;  %1680 = vrsqrt.f32 %v673_v40  ;;  %v583_v52 = vsub.f32 %v487_v29, %v535_v7  ;;  %v489_v30 = vmul.f32 0.020408163, %v383_v57  ;;  %1107 = vperm.xlu1 %1605, %v2757_v32   ;;  %v537_v57 = vmul.f32 %v2751_v22, %v2751_v22  ;;  %3683 = vst [vmem:[#allocation44_spill] sm:$0xff] %v2773_v23 }
 0x147   :  { %v1671_v17 = vpop.eup %1670  ;;  %v680_v13 = vadd.f32 0.001, %v632_v28  ;;  %v586_v6 = vsub.f32 %v490_v60, %v538_v62  ;;  %v772_v62 = vld [vmem:[%s3596_s1 + $0x128] sm:$0xff]  ;;  %v2776_v29 = vmul.f32 %v1669_v43, %v763_v21  ;;  %v542_v60 = vmul.f32 %v2754_v27, %v2754_v27 }
 0x148   :  { %v392_v5 = vpop.xlane.xlu1 %391  ;;  %v2763_v54 = vmul.f32 %v1671_v17, %v770_v47  ;;  %v1673_v16 = vpop.eup %1672  ;;  %v765_v17 = vld [vmem:[%s3596_s1 + $0xf0] sm:$0xff] }
 0x149   :  { %v389_v38 = vpop.xlane.xlu0 %388  ;;  %1682 = vrsqrt.f32 %v680_v13  ;;  %v634_v40 = vmax.f32 %v586_v6, 0.0  ;;  %v492_v14 = vmul.f32 0.020408163, %v392_v5  ;;  %v677_v13 = vadd.f32 0.001, %v629_v45 }
 0x14a   :  { %1152 = vperm.xlu0 %1604, %v2763_v54   ;;  %1684 = vrsqrt.f32 %v675_v46  ;;  %v631_v6 = vmax.f32 %v583_v52, 0.0  ;;  %v585_v5 = vsub.f32 %v489_v30, %v537_v57  ;;  %1117 = vperm.xlu1 %1605, %v2776_v29   ;;  %v491_v21 = vmul.f32 0.020408163, %v389_v38  ;;  %v774_v46 = vld [vmem:[%s3596_s1 + $0x138] sm:$0xff] }
 0x14b   :  { %v1675_v28 = vpop.eup %1674  ;;  %v682_v47 = vadd.f32 0.001, %v634_v40  ;;  %v588_v7 = vsub.f32 %v492_v14, %v540_v19  ;;  %v2790_v45 = vmul.f32 %v1673_v16, %v765_v17  ;;  %v539_v30 = vmul.f32 %v2773_v23, %v2773_v23  ;;  %v3684_v14 = vld [vmem:[#allocation2_spill] sm:$0xff] }
 0x14c   :  { %v398_v33 = vpop.xlane.xlu1 %397  ;;  %v2784_v22 = vmul.f32 %v1675_v28, %v772_v62  ;;  %v1677_v19 = vpop.eup %1676  ;;  %v2795_v62 = vmul.f32 0.020408163, %v3684_v14  ;;  %v767_v28 = vld [vmem:[%s3596_s1 + $0x100] sm:$0xff] }
 0x14d   :  { %1686 = vrsqrt.f32 %v682_v47  ;;  %v636_v43 = vmax.f32 %v588_v7, 0.0  ;;  %v494_v41 = vmul.f32 0.020408163, %v398_v33  ;;  %v395_v40 = vpop.xlane.xlu0 %394  ;;  %v679_v47 = vadd.f32 0.001, %v631_v6 }
 0x14e   :  { %1162 = vperm.xlu0 %1604, %v2784_v22   ;;  %1688 = vrsqrt.f32 %v677_v13  ;;  %v633_v7 = vmax.f32 %v585_v5, 0.0  ;;  %1127 = vperm.xlu1 %1605, %v2790_v45   ;;  %v587_v33 = vsub.f32 %v491_v21, %v539_v30  ;;  %v493_v27 = vmul.f32 0.020408163, %v395_v40  ;;  %v778_v30 = vld [vmem:[%s3596_s1 + $0x158] sm:$0xff] }
 0x14f   :  { %v1679_v52 = vpop.eup %1678  ;;  %v684_v57 = vadd.f32 0.001, %v636_v43  ;;  %v590_v38 = vsub.f32 %v494_v41, %v542_v60  ;;  %v776_v41 = vld [vmem:[%s3596_s1 + $0x148] sm:$0xff]  ;;  %v2807_v60 = vmul.f32 %v1677_v19, %v767_v28  ;;  %v541_v6 = vmul.f32 %v2795_v62, %v2795_v62  ;;  %v769_v43 = vld [vmem:[%s3596_s1 + $0x110] sm:$0xff] }
 0x150   :  { %v2801_v16 = vmul.f32 %v1679_v52, %v774_v46  ;;  %v1681_v17 = vpop.eup %1680  ;;  %v681_v40 = vadd.f32 0.001, %v633_v7  ;;  %v635_v52 = vmax.f32 %v587_v33, 0.0 }
 0x151   :  { %1690 = vrsqrt.f32 %v684_v57  ;;  %v638_v23 = vmax.f32 %v590_v38, 0.0  ;;  %v589_v19 = vsub.f32 %v493_v27, %v541_v6  ;;  %v771_v57 = vld [vmem:[%s3596_s1 + $0x120] sm:$0xff] }
 0x152   :  { %1172 = vperm.xlu0 %1604, %v2801_v16   ;;  %1692 = vrsqrt.f32 %v679_v47  ;;  %1137 = vperm.xlu1 %1605, %v2807_v60   ;;  %v683_v28 = vadd.f32 0.001, %v635_v52  ;;  %v780_v47 = vld [vmem:[%s3596_s1 + $0x168] sm:$0xff]  ;;  %v775_v52 = vld [vmem:[%s3596_s1 + $0x140] sm:$0xff] }
 0x153   :  { %v1683_v13 = vpop.eup %1682  ;;  %v686_v5 = vadd.f32 0.001, %v638_v23  ;;  %v2821_v23 = vmul.f32 %v1681_v17, %v769_v43  ;;  %v637_v27 = vmax.f32 %v589_v19, 0.0  ;;  %v3685_v19 = vld [vmem:[#allocation4_spill] sm:$0xff] }
 0x154   :  { %v2815_v21 = vmul.f32 %v1683_v13, %v776_v41  ;;  %v1685_v46 = vpop.eup %1684  ;;  %v773_v41 = vld [vmem:[%s3596_s1 + $0x130] sm:$0xff] }
 0x155   :  { %1694 = vrsqrt.f32 %v686_v5  ;;  %v2833_v17 = vmul.f32 %v1685_v46, %v771_v57  ;;  %v685_v6 = vadd.f32 0.001, %v637_v27  ;;  %v782_v5 = vld [vmem:[%s3596_s1 + $0x178] sm:$0xff]  ;;  %v832_v57 = vld [vmem:[%s3597_s2 + $0x8] sm:$0xff] }
 0x156   :  { %1182 = vperm.xlu0 %1604, %v2815_v21   ;;  %1147 = vperm.xlu1 %1605, %v2821_v23   ;;  %1696 = vrsqrt.f32 %v681_v40 }
 0x157   :  { %v1687_v14 = vpop.eup %1686  ;;  %1698 = vrsqrt.f32 %v683_v28 }
 0x158   :  { %v2827_v38 = vmul.f32 %v1687_v14, %v778_v30  ;;  %v1689_v7 = vpop.eup %1688  ;;  %v880_v30 = vmul.f32 %v2406_v8, %v3685_v19  ;;  %1700 = vrsqrt.f32 %v685_v6 }
 0x159   :  { %v2845_v46 = vmul.f32 %v1689_v7, %v773_v41  ;;  %v3686_v7 = vld [vmem:[#allocation6_spill] sm:$0xff]  ;;  %v834_v41 = vld [vmem:[%s3597_s2 + $0x18] sm:$0xff] }
 0x15a   :  { %1192 = vperm.xlu0 %1604, %v2827_v38   ;;  %1157 = vperm.xlu1 %1605, %v2833_v17   ;;  %v928_v8 = vsub.f32 %v832_v57, %v880_v30  ;;  %v781_v57 = vld [vmem:[%s3596_s1 + $0x170] sm:$0xff] }
 0x15b   :  { %v1691_v33 = vpop.eup %1690 }
 0x15c   :  { %v2839_v13 = vmul.f32 %v1691_v33, %v780_v47  ;;  %v1693_v43 = vpop.eup %1692  ;;  %v777_v47 = vld [vmem:[%s3596_s1 + $0x150] sm:$0xff]  ;;  %v882_v33 = vmul.f32 %v2455_v53, %v3686_v7  ;;  %v836_v53 = vld [vmem:[%s3597_s2 + $0x28] sm:$0xff] }
 0x15d   :  { %v2859_v28 = vmul.f32 %v1693_v43, %v775_v52  ;;  %v779_v43 = vld [vmem:[%s3596_s1 + $0x160] sm:$0xff]  ;;  %v884_v52 = vmul.f32 %v2498_v42, %v2368_v48  ;;  %v838_v48 = vld [vmem:[%s3597_s2 + $0x38] sm:$0xff]  ;;  %v3687_v42 = vld [vmem:[#allocation3_spill] sm:$0xff] }
 0x15e   :  { %1202 = vperm.xlu0 %1604, %v2839_v13   ;;  %1167 = vperm.xlu1 %1605, %v2845_v46  }
 0x15f   :  { %v1695_v40 = vpop.eup %1694 }
 0x160   :  { %v2853_v14 = vmul.f32 %v1695_v40, %v782_v5  ;;  %v1697_v27 = vpop.eup %1696  ;;  %v930_v40 = vsub.f32 %v834_v41, %v882_v33  ;;  %v831_v33 = vld [vmem:[%s3597_s2] sm:$0xff] }
 0x161   :  { %v2870_v6 = vmul.f32 %v1697_v27, %v777_v47  ;;  %v1699_v5 = vpop.eup %1698  ;;  %v932_v27 = vsub.f32 %v836_v53, %v884_v52  ;;  %v886_v47 = vmul.f32 %v2542_v55, %v2381_v36  ;;  %v888_v36 = vmul.f32 %v2481_v35, %v2384_v12  ;;  %v840_v55 = vld [vmem:[%s3597_s2 + $0x48] sm:$0xff]  ;;  %v3689_v53 = vld [vmem:[#allocation9_spill] sm:$0xff] }
 0x162   :  { %1212 = vperm.xlu0 %1604, %v2853_v14   ;;  %1177 = vperm.xlu1 %1605, %v2859_v28   ;;  %v2881_v19 = vmul.f32 %v1699_v5, %v779_v43  ;;  %v1701_v30 = vpop.eup %1700  ;;  %v842_v12 = vld [vmem:[%s3597_s2 + $0x58] sm:$0xff] }
 0x163   :  { %v2894_v7 = vmul.f32 %v1701_v30, %v781_v57  ;;  %v934_v41 = vsub.f32 %v838_v48, %v886_v47  ;;  %v936_v52 = vsub.f32 %v840_v55, %v888_v36  ;;  %v890_v30 = vmul.f32 %v2504_v11, %v3689_v53  ;;  %v3690_v57 = vld [vmem:[#allocation7_spill] sm:$0xff]  ;;  %v3692_v55 = vld [vmem:[#allocation10_spill] sm:$0xff] }
 0x164   :  { %v892_v48 = vmul.f32 %v2525_v4, %v2409_v61  ;;  %v844_v11 = vld [vmem:[%s3597_s2 + $0x68] sm:$0xff]  ;;  %v894_v36 = vmul.f32 %v2548_v49, %v2420_v2  ;;  %v846_v61 = vld [vmem:[%s3597_s2 + $0x78] sm:$0xff] }
 0x165   :  { %v938_v47 = vsub.f32 %v842_v12, %v890_v30  ;;  %v848_v2 = vld [vmem:[%s3597_s2 + $0x88] sm:$0xff]  ;;  %v3695_v12 = vld [vmem:[#allocation16_spill] sm:$0xff] }
 0x166   :  { %1270 = vperm.xlu0 %1604, %v928_v8   ;;  %1187 = vperm.xlu1 %1605, %v2870_v6   ;;  %v879_v8 = vmul.f32 %v2417_v1, %v3687_v42  ;;  %v3688_v1 = vld [vmem:[#allocation5_spill] sm:$0xff] }
 0x167   :  { %v881_v43 = vmul.f32 %v2436_v31, %v3688_v1  ;;  %v835_v31 = vld [vmem:[%s3597_s2 + $0x20] sm:$0xff]  ;;  %v942_v1 = vsub.f32 %v846_v61, %v894_v36  ;;  %v3699_v61 = vld [vmem:[#allocation20_spill] sm:$0xff] }
 0x168   :  { %v927_v5 = vsub.f32 %v831_v33, %v879_v8  ;;  %v3691_v8 = vld [vmem:[#allocation8_spill] sm:$0xff] }
 0x169   :  { %v885_v33 = vmul.f32 %v2519_v34, %v3691_v8  ;;  %v839_v34 = vld [vmem:[%s3597_s2 + $0x40] sm:$0xff] }
 0x16a   :  { %1280 = vperm.xlu0 %1604, %v930_v40   ;;  %1197 = vperm.xlu1 %1605, %v2881_v19   ;;  %v833_v40 = vld [vmem:[%s3597_s2 + $0x10] sm:$0xff] }
 0x16b   :  { %v929_v35 = vsub.f32 %v833_v40, %v881_v43  ;;  %v3693_v43 = vld [vmem:[#allocation14_spill] sm:$0xff] }
 0x16c   :  { %v896_v40 = vmul.f32 %v2569_v0, %v3693_v43  ;;  %v850_v0 = vld [vmem:[%s3597_s2 + $0x98] sm:$0xff] }
 0x16e   :  { %1290 = vperm.xlu0 %1604, %v932_v27   ;;  %1207 = vperm.xlu1 %1605, %v2894_v7   ;;  %v883_v27 = vmul.f32 %v2475_v39, %v3690_v57  ;;  %v837_v39 = vld [vmem:[%s3597_s2 + $0x30] sm:$0xff]  ;;  %v944_v30 = vsub.f32 %v848_v2, %v896_v40  ;;  %v3701_v40 = vld [vmem:[#allocation22_spill] sm:$0xff] }
 0x16f   :  { %v933_v4 = vsub.f32 %v837_v39, %v885_v33  ;;  %v3698_v33 = vld [vmem:[#allocation13_spill] sm:$0xff] }
 0x170   :  { %v931_v42 = vsub.f32 %v835_v31, %v883_v27  ;;  %v3696_v31 = vld [vmem:[#allocation12_spill] sm:$0xff]  ;;  %v893_v39 = vmul.f32 %v2630_v20, %v3698_v33 }
 0x172   :  { %1300 = vperm.xlu0 %1604, %v934_v41   ;;  %1265 = vperm.xlu1 %1605, %v927_v5   ;;  %v940_v41 = vsub.f32 %v844_v11, %v892_v48  ;;  %v887_v5 = vmul.f32 %v2563_v50, %v3692_v55  ;;  %v841_v50 = vld [vmem:[%s3597_s2 + $0x50] sm:$0xff]  ;;  %v3697_v11 = vld [vmem:[#allocation18_spill] sm:$0xff] }
 0x174   :  { %v935_v49 = vsub.f32 %v839_v34, %v887_v5  ;;  %v3700_v5 = vld [vmem:[#allocation15_spill] sm:$0xff] }
 0x175   :  { %v895_v20 = vmul.f32 %v2651_v63, %v3700_v5  ;;  %v3702_v63 = vld [vmem:[#allocation17_spill] sm:$0xff] }
 0x176   :  { %1310 = vperm.xlu0 %1604, %v936_v52   ;;  %1275 = vperm.xlu1 %1605, %v929_v35   ;;  %v3694_v52 = vld [vmem:[#allocation11_spill] sm:$0xff]  ;;  %v898_v35 = vmul.f32 %v2592_v3, %v3695_v12  ;;  %v900_v3 = vmul.f32 %v2613_v9, %v3697_v11  ;;  %v902_v9 = vmul.f32 %v2636_v10, %v3699_v61 }
 0x177   :  { %v889_v53 = vmul.f32 %v2586_v59, %v3694_v52  ;;  %v891_v59 = vmul.f32 %v2607_v58, %v3696_v31  ;;  %v845_v58 = vld [vmem:[%s3597_s2 + $0x70] sm:$0xff]  ;;  %v904_v10 = vmul.f32 %v2657_v56, %v3701_v40 }
 0x178   :  { %v946_v48 = vsub.f32 %v850_v0, %v898_v35  ;;  %v941_v55 = vsub.f32 %v845_v58, %v893_v39  ;;  %v3703_v56 = vld [vmem:[#allocation24_spill] sm:$0xff] }
 0x179   :  { %v937_v27 = vsub.f32 %v841_v50, %v889_v53  ;;  %v897_v53 = vmul.f32 %v2674_v24, %v3702_v63  ;;  %v906_v35 = vmul.f32 %v2680_v18, %v3703_v56  ;;  %v3704_v24 = vld [vmem:[#allocation19_spill] sm:$0xff]  ;;  %v3705_v18 = vld [vmem:[#allocation26_spill] sm:$0xff] }
 0x17a   :  { %1320 = vperm.xlu0 %1604, %v938_v47   ;;  %1285 = vperm.xlu1 %1605, %v931_v42   ;;  %v843_v47 = vld [vmem:[%s3597_s2 + $0x60] sm:$0xff]  ;;  %v852_v42 = vld [vmem:[%s3597_s2 + $0xa8] sm:$0xff] }
 0x17b   :  { %v939_v8 = vsub.f32 %v843_v47, %v891_v59  ;;  %v948_v36 = vsub.f32 %v852_v42, %v900_v3  ;;  %v899_v59 = vmul.f32 %v2692_v44, %v3704_v24  ;;  %v908_v3 = vmul.f32 %v2698_v26, %v3705_v18  ;;  %v3706_v44 = vld [vmem:[#allocation21_spill] sm:$0xff]  ;;  %v3707_v26 = vld [vmem:[#allocation28_spill] sm:$0xff] }
 0x17c   :  { %v901_v39 = vmul.f32 %v2713_v25, %v3706_v44  ;;  %v3708_v25 = vld [vmem:[#allocation23_spill] sm:$0xff] }
 0x17e   :  { %1330 = vperm.xlu0 %1604, %v940_v41   ;;  %1295 = vperm.xlu1 %1605, %v933_v4   ;;  %v854_v4 = vld [vmem:[%s3597_s2 + $0xb8] sm:$0xff] }
 0x17f   :  { %v950_v43 = vsub.f32 %v854_v4, %v902_v9  ;;  %v910_v9 = vmul.f32 %v2719_v51, %v3707_v26  ;;  %v3709_v51 = vld [vmem:[#allocation30_spill] sm:$0xff] }
 0x182   :  { %1340 = vperm.xlu0 %1604, %v942_v1   ;;  %1305 = vperm.xlu1 %1605, %v935_v49   ;;  %v847_v1 = vld [vmem:[%s3597_s2 + $0x80] sm:$0xff]  ;;  %v856_v49 = vld [vmem:[%s3597_s2 + $0xc8] sm:$0xff] }
 0x183   :  { %v943_v52 = vsub.f32 %v847_v1, %v895_v20  ;;  %v952_v12 = vsub.f32 %v856_v49, %v904_v10  ;;  %v903_v20 = vmul.f32 %v2734_v15, %v3708_v25  ;;  %v912_v10 = vmul.f32 %v2740_v37, %v3709_v51  ;;  %v3710_v15 = vld [vmem:[#allocation25_spill] sm:$0xff]  ;;  %v3711_v37 = vld [vmem:[#allocation32_spill] sm:$0xff] }
 0x185   :  { %v2952_v57 = vpop.permute.xlu1 %982 }
 0x186   :  { %1350 = vperm.xlu0 %1604, %v944_v30   ;;  %1315 = vperm.xlu1 %1605, %v937_v27   ;;  %v2988_v2 = vpop.permute.xlu0 %977  ;;  %v849_v30 = vld [vmem:[%s3597_s2 + $0x90] sm:$0xff]  ;;  %v858_v27 = vld [vmem:[%s3597_s2 + $0xd8] sm:$0xff] }
 0x187   :  { %v945_v31 = vsub.f32 %v849_v30, %v897_v53  ;;  %v954_v11 = vsub.f32 %v858_v27, %v906_v35  ;;  %v905_v53 = vmul.f32 %v2757_v32, %v3710_v15  ;;  %v914_v35 = vmul.f32 %v2763_v54, %v3711_v37  ;;  %v3712_v32 = vld [vmem:[#allocation27_spill] sm:$0xff]  ;;  %v3713_v54 = vld [vmem:[#allocation34_spill] sm:$0xff] }
 0x189   :  { %v2969_v41 = vpop.permute.xlu1 %987 }
 0x18a   :  { %1360 = vperm.xlu0 %1604, %v946_v48   ;;  %1325 = vperm.xlu1 %1605, %v939_v8   ;;  %v851_v48 = vld [vmem:[%s3597_s2 + $0xa0] sm:$0xff]  ;;  %v860_v8 = vld [vmem:[%s3597_s2 + $0xe8] sm:$0xff] }
 0x18b   :  { %v947_v33 = vsub.f32 %v851_v48, %v899_v59  ;;  %v956_v61 = vsub.f32 %v860_v8, %v908_v3  ;;  %v907_v59 = vmul.f32 %v2776_v29, %v3712_v32  ;;  %v916_v3 = vmul.f32 %v2784_v22, %v3713_v54  ;;  %v3714_v29 = vld [vmem:[#allocation29_spill] sm:$0xff]  ;;  %v3715_v22 = vld [vmem:[#allocation36_spill] sm:$0xff] }
 0x18d   :  { %v2981_v34 = vpop.permute.xlu1 %992 }
 0x18e   :  { %1370 = vperm.xlu0 %1604, %v948_v36   ;;  %1335 = vperm.xlu1 %1605, %v941_v55   ;;  %v853_v36 = vld [vmem:[%s3597_s2 + $0xb0] sm:$0xff]  ;;  %v862_v55 = vld [vmem:[%s3597_s2 + $0xf8] sm:$0xff] }
 0x18f   :  { %v949_v5 = vsub.f32 %v853_v36, %v901_v39  ;;  %v958_v40 = vsub.f32 %v862_v55, %v910_v9  ;;  %v909_v39 = vmul.f32 %v2790_v45, %v3714_v29  ;;  %v918_v9 = vmul.f32 %v2801_v16, %v3715_v22  ;;  %v3716_v45 = vld [vmem:[#allocation31_spill] sm:$0xff]  ;;  %v3717_v16 = vld [vmem:[#allocation37_spill] sm:$0xff] }
 0x191   :  { %v2995_v50 = vpop.permute.xlu1 %997 }
 0x192   :  { %1380 = vperm.xlu0 %1604, %v950_v43   ;;  %1345 = vperm.xlu1 %1605, %v943_v52   ;;  %v855_v43 = vld [vmem:[%s3597_s2 + $0xc0] sm:$0xff]  ;;  %v864_v52 = vld [vmem:[%s3597_s2 + $0x108] sm:$0xff] }
 0x193   :  { %v951_v63 = vsub.f32 %v855_v43, %v903_v20  ;;  %v960_v56 = vsub.f32 %v864_v52, %v912_v10  ;;  %v911_v20 = vmul.f32 %v2807_v60, %v3716_v45  ;;  %v920_v10 = vmul.f32 %v2815_v21, %v3717_v16  ;;  %v3718_v60 = vld [vmem:[#allocation33_spill] sm:$0xff]  ;;  %v3719_v21 = vld [vmem:[#allocation39_spill] sm:$0xff] }
 0x195   :  { %v3002_v0 = vpop.permute.xlu0 %1022  ;;  %v3009_v47 = vpop.permute.xlu1 %1002 }
 0x196   :  { %1390 = vperm.xlu0 %1604, %v952_v12   ;;  %1355 = vperm.xlu1 %1605, %v945_v31   ;;  %v857_v12 = vld [vmem:[%s3597_s2 + $0xd0] sm:$0xff]  ;;  %v866_v31 = vld [vmem:[%s3597_s2 + $0x118] sm:$0xff] }
 0x197   :  { %v953_v24 = vsub.f32 %v857_v12, %v905_v53  ;;  %v962_v18 = vsub.f32 %v866_v31, %v914_v35  ;;  %v913_v53 = vmul.f32 %v2821_v23, %v3718_v60  ;;  %v922_v35 = vmul.f32 %v2827_v38, %v3719_v21  ;;  %v3720_v23 = vld [vmem:[#allocation35_spill] sm:$0xff]  ;;  %v3721_v38 = vld [vmem:[#allocation41_spill] sm:$0xff] }
 0x199   :  { %v3016_v42 = vpop.permute.xlu0 %1032  ;;  %v3023_v58 = vpop.permute.xlu1 %1007 }
 0x19a   :  { %1400 = vperm.xlu0 %1604, %v954_v11   ;;  %1365 = vperm.xlu1 %1605, %v947_v33   ;;  %v859_v11 = vld [vmem:[%s3597_s2 + $0xe0] sm:$0xff]  ;;  %v868_v33 = vld [vmem:[%s3597_s2 + $0x128] sm:$0xff] }
 0x19b   :  { %v955_v44 = vsub.f32 %v859_v11, %v907_v59  ;;  %v964_v26 = vsub.f32 %v868_v33, %v916_v3  ;;  %v915_v59 = vmul.f32 %v2833_v17, %v3720_v23  ;;  %v924_v3 = vmul.f32 %v2839_v13, %v3721_v38  ;;  %v3722_v17 = vld [vmem:[#allocation38_spill] sm:$0xff]  ;;  %v3723_v13 = vld [vmem:[#allocation43_spill] sm:$0xff] }
 0x19c   :  { %v925_v23 = vmul.f32 %v2894_v7, %v2795_v62 }
 0x19d   :  { %v3030_v4 = vpop.permute.xlu0 %1042  ;;  %v3037_v1 = vpop.permute.xlu1 %1012 }
 0x19e   :  { %1410 = vperm.xlu0 %1604, %v956_v61   ;;  %1375 = vperm.xlu1 %1605, %v949_v5   ;;  %v861_v61 = vld [vmem:[%s3597_s2 + $0xf0] sm:$0xff]  ;;  %v870_v5 = vld [vmem:[%s3597_s2 + $0x138] sm:$0xff] }
 0x19f   :  { %v957_v25 = vsub.f32 %v861_v61, %v909_v39  ;;  %v966_v51 = vsub.f32 %v870_v5, %v918_v9  ;;  %v917_v39 = vmul.f32 %v2845_v46, %v3722_v17  ;;  %v926_v9 = vmul.f32 %v2853_v14, %v3723_v13  ;;  %v3724_v46 = vld [vmem:[#allocation40_spill] sm:$0xff] }
 0x1a1   :  { %v3044_v49 = vpop.permute.xlu0 %1052  ;;  %v3051_v30 = vpop.permute.xlu1 %1017 }
 0x1a2   :  { %1420 = vperm.xlu0 %1604, %v958_v40   ;;  %1385 = vperm.xlu1 %1605, %v951_v63   ;;  %v863_v40 = vld [vmem:[%s3597_s2 + $0x100] sm:$0xff]  ;;  %v872_v63 = vld [vmem:[%s3597_s2 + $0x148] sm:$0xff] }
 0x1a3   :  { %v959_v15 = vsub.f32 %v863_v40, %v911_v20  ;;  %v968_v37 = vsub.f32 %v872_v63, %v920_v10  ;;  %v919_v20 = vmul.f32 %v2859_v28, %v3724_v46  ;;  %v3725_v63 = vld [vmem:[#allocation42_spill] sm:$0xff]  ;;  %v873_v28 = vld [vmem:[%s3597_s2 + $0x150] sm:$0xff] }
 0x1a5   :  { %v3058_v27 = vpop.permute.xlu0 %1062  ;;  %v3065_v48 = vpop.permute.xlu1 %1027 }
 0x1a6   :  { %1430 = vperm.xlu0 %1604, %v960_v56   ;;  %1395 = vperm.xlu1 %1605, %v953_v24   ;;  %v865_v56 = vld [vmem:[%s3597_s2 + $0x110] sm:$0xff]  ;;  %v874_v24 = vld [vmem:[%s3597_s2 + $0x158] sm:$0xff] }
 0x1a7   :  { %v961_v32 = vsub.f32 %v865_v56, %v913_v53  ;;  %v970_v54 = vsub.f32 %v874_v24, %v922_v35  ;;  %v875_v24 = vld [vmem:[%s3597_s2 + $0x160] sm:$0xff] }
 0x1a9   :  { %v3072_v8 = vpop.permute.xlu0 %1072  ;;  %v3079_v36 = vpop.permute.xlu1 %1037 }
 0x1aa   :  { %1440 = vperm.xlu0 %1604, %v962_v18   ;;  %1405 = vperm.xlu1 %1605, %v955_v44   ;;  %v867_v18 = vld [vmem:[%s3597_s2 + $0x120] sm:$0xff]  ;;  %v876_v44 = vld [vmem:[%s3597_s2 + $0x168] sm:$0xff] }
 0x1ab   :  { %v963_v29 = vsub.f32 %v867_v18, %v915_v59  ;;  %v972_v22 = vsub.f32 %v876_v44, %v924_v3  ;;  %v877_v18 = vld [vmem:[%s3597_s2 + $0x170] sm:$0xff] }
 0x1ad   :  { %v3086_v55 = vpop.permute.xlu0 %1082  ;;  %v3093_v43 = vpop.permute.xlu1 %1047 }
 0x1ae   :  { %1450 = vperm.xlu0 %1604, %v964_v26   ;;  %1415 = vperm.xlu1 %1605, %v957_v25   ;;  %v869_v26 = vld [vmem:[%s3597_s2 + $0x130] sm:$0xff]  ;;  %v878_v25 = vld [vmem:[%s3597_s2 + $0x178] sm:$0xff] }
 0x1af   :  { %v965_v45 = vsub.f32 %v869_v26, %v917_v39  ;;  %v974_v16 = vsub.f32 %v878_v25, %v926_v9  ;;  %v1702_v9 = vld [vmem:[%s3595_s0 + $0x8] sm:$0xff] }
 0x1b0   :  { %v1216_v25 = vmul.f32 %v1702_v9, %v2952_v57  ;;  %v1704_v57 = vld [vmem:[%s3595_s0 + $0x28] sm:$0xff] }
 0x1b1   :  { %v3100_v52 = vpop.permute.xlu0 %1092  ;;  %v3107_v12 = vpop.permute.xlu1 %1057  ;;  %v1707_v9 = vld [vmem:[%s3595_s0 + $0x48] sm:$0xff] }
 0x1b2   :  { %1460 = vperm.xlu0 %1604, %v966_v51   ;;  %1425 = vperm.xlu1 %1605, %v959_v15   ;;  %v871_v51 = vld [vmem:[%s3597_s2 + $0x140] sm:$0xff]  ;;  %v921_v15 = vmul.f32 %v2870_v6, %v3725_v63 }
 0x1b3   :  { %v967_v10 = vsub.f32 %v871_v51, %v919_v20  ;;  %v1703_v51 = vld [vmem:[%s3595_s0 + $0x18] sm:$0xff] }
 0x1b4   :  { %v969_v56 = vsub.f32 %v873_v28, %v921_v15  ;;  %v1220_v28 = vmul.f32 %v1704_v57, %v3009_v47  ;;  %v1710_v57 = vld [vmem:[%s3595_s0 + $0x20] sm:$0xff] }
 0x1b5   :  { %v3114_v31 = vpop.permute.xlu0 %1102  ;;  %v3121_v11 = vpop.permute.xlu1 %1067 }
 0x1b6   :  { %1470 = vperm.xlu0 %1604, %v968_v37   ;;  %1435 = vperm.xlu1 %1605, %v961_v32   ;;  %v3726_v37 = vld [vmem:[#allocation44_spill] sm:$0xff] }
 0x1b7   :  { %v923_v21 = vmul.f32 %v2881_v19, %v3726_v37 }
 0x1b9   :  { %v3128_v33 = vpop.permute.xlu0 %1112  ;;  %v3135_v61 = vpop.permute.xlu1 %1077  ;;  %v971_v32 = vsub.f32 %v875_v24, %v923_v21  ;;  %v1705_v21 = vld [vmem:[%s3595_s0 + $0x38] sm:$0xff] }
 0x1ba   :  { %1480 = vperm.xlu0 %1604, %v970_v54   ;;  %1445 = vperm.xlu1 %1605, %v963_v29   ;;  %v973_v54 = vsub.f32 %v877_v18, %v925_v23  ;;  %v1222_v24 = vmul.f32 %v1705_v21, %v3037_v1  ;;  %v1224_v1 = vmul.f32 %v1707_v9, %v3002_v0 }
 0x1bd   :  { %v3142_v5 = vpop.permute.xlu0 %1122  ;;  %v3149_v40 = vpop.permute.xlu1 %1087 }
 0x1be   :  { %1490 = vperm.xlu0 %1604, %v972_v22   ;;  %1455 = vperm.xlu1 %1605, %v965_v45  }
 0x1c1   :  { %v3154_v14 = vpop.permute.xlu0 %1132  ;;  %v3158_v60 = vpop.permute.xlu1 %1097 }
 0x1c2   :  { %1500 = vperm.xlu0 %1604, %v974_v16   ;;  %1465 = vperm.xlu1 %1605, %v967_v10   ;;  %v1218_v16 = vmul.f32 %v1703_v51, %v2981_v34 }
 0x1c5   :  { %v3163_v53 = vpop.permute.xlu0 %1142  ;;  %v3167_v35 = vpop.permute.xlu1 %1107 }
 0x1c6   :  { %1475 = vperm.xlu1 %1605, %v969_v56  }
 0x1c9   :  { %v3172_v6 = vpop.permute.xlu0 %1152  ;;  %v3176_v59 = vpop.permute.xlu1 %1117 }
 0x1ca   :  { %1485 = vperm.xlu1 %1605, %v971_v32   ;;  %v1706_v32 = vld [vmem:[%s3595_s0] sm:$0xff] }
 0x1cb   :  { %v1215_v23 = vmul.f32 %v1706_v32, %v2988_v2 }
 0x1cd   :  { %v3181_v19 = vpop.permute.xlu0 %1162  ;;  %v3183_v38 = vpop.permute.xlu1 %1127 }
 0x1ce   :  { %1495 = vperm.xlu1 %1605, %v973_v54  }
 0x1d1   :  { %v3185_v3 = vpop.permute.xlu0 %1172  ;;  %v3187_v44 = vpop.permute.xlu1 %1137 }
 0x1d5   :  { %v3189_v29 = vpop.permute.xlu0 %1182  ;;  %v3191_v62 = vpop.permute.xlu1 %1147 }
 0x1d9   :  { %v3193_v7 = vpop.permute.xlu0 %1192  ;;  %v3195_v17 = vpop.permute.xlu1 %1157 }
 0x1dd   :  { %v3197_v39 = vpop.permute.xlu0 %1202  ;;  %v3199_v26 = vpop.permute.xlu1 %1167 }
 0x1e1   :  { %v3201_v22 = vpop.permute.xlu0 %1212  ;;  %v3203_v13 = vpop.permute.xlu1 %1177 }
 0x1e5   :  { %v1271_v45 = vpop.permute.xlu0 %1270  ;;  %v3209_v20 = vpop.permute.xlu1 %1187 }
 0x1e6   :  { %v1504_v46 = vadd.f32 %v1271_v45, %v1216_v25 }
 0x1e8   :  { %1552 = vst.msk [vmem:[%s3598_s3 + $0x8] sm:$0xff] %vm62_vm0, %v1504_v46  ;;  %v1708_v46 = vld [vmem:[%s3595_s0 + $0x10] sm:$0xff] }
 0x1e9   :  { %v1281_v10 = vpop.permute.xlu0 %1280  ;;  %v3219_v15 = vpop.permute.xlu1 %1197  ;;  %v1217_v2 = vmul.f32 %v1708_v46, %v2969_v41  ;;  %v1715_v46 = vld [vmem:[%s3595_s0 + $0x88] sm:$0xff] }
 0x1ea   :  { %v1506_v63 = vadd.f32 %v1281_v10, %v1218_v16  ;;  %v1709_v16 = vld [vmem:[%s3595_s0 + $0x58] sm:$0xff] }
 0x1eb   :  { %v1226_v10 = vmul.f32 %v1709_v16, %v3016_v42 }
 0x1ec   :  { %1554 = vst.msk [vmem:[%s3598_s3 + $0x18] sm:$0xff] %vm62_vm0, %v1506_v63 }
 0x1ed   :  { %v1291_v34 = vpop.permute.xlu0 %1290  ;;  %v3229_v37 = vpop.permute.xlu1 %1207 }
 0x1ee   :  { %v1508_v56 = vadd.f32 %v1291_v34, %v1220_v28  ;;  %v1219_v28 = vmul.f32 %v1710_v57, %v2995_v50 }
 0x1f0   :  { %1556 = vst.msk [vmem:[%s3598_s3 + $0x28] sm:$0xff] %vm62_vm0, %v1508_v56  ;;  %v1711_v56 = vld [vmem:[%s3595_s0 + $0x68] sm:$0xff] }
 0x1f1   :  { %v1301_v47 = vpop.permute.xlu0 %1300  ;;  %v1266_v54 = vpop.permute.xlu1 %1265  ;;  %v1228_v21 = vmul.f32 %v1711_v56, %v3030_v4  ;;  %v1719_v56 = vld [vmem:[%s3595_s0 + $0xa8] sm:$0xff] }
 0x1f2   :  { %v1510_v18 = vadd.f32 %v1301_v47, %v1222_v24  ;;  %v1503_v25 = vadd.f32 %v1266_v54, %v1215_v23  ;;  %v1712_v47 = vld [vmem:[%s3595_s0 + $0x30] sm:$0xff] }
 0x1f3   :  { %v1221_v32 = vmul.f32 %v1712_v47, %v3023_v58 }
 0x1f4   :  { %1558 = vst.msk [vmem:[%s3598_s3 + $0x38] sm:$0xff] %vm62_vm0, %v1510_v18  ;;  %1551 = vst.msk [vmem:[%s3598_s3] sm:$0xff] %vm62_vm0, %v1503_v25  ;;  %v1713_v18 = vld [vmem:[%s3595_s0 + $0x78] sm:$0xff] }
 0x1f5   :  { %v1311_v45 = vpop.permute.xlu0 %1310  ;;  %v1276_v0 = vpop.permute.xlu1 %1275  ;;  %v1230_v54 = vmul.f32 %v1713_v18, %v3044_v49 }
 0x1f6   :  { %v1512_v51 = vadd.f32 %v1311_v45, %v1224_v1  ;;  %v1505_v63 = vadd.f32 %v1276_v0, %v1217_v2  ;;  %v1714_v1 = vld [vmem:[%s3595_s0 + $0x40] sm:$0xff]  ;;  %v1232_v2 = vmul.f32 %v1715_v46, %v3058_v27  ;;  %v1716_v0 = vld [vmem:[%s3595_s0 + $0x50] sm:$0xff] }
 0x1f7   :  { %v1223_v25 = vmul.f32 %v1714_v1, %v3051_v30  ;;  %v1225_v16 = vmul.f32 %v1716_v0, %v3065_v48  ;;  %v1723_v1 = vld [vmem:[%s3595_s0 + $0xc8] sm:$0xff] }
 0x1f8   :  { %1560 = vst.msk [vmem:[%s3598_s3 + $0x48] sm:$0xff] %vm62_vm0, %v1512_v51  ;;  %1553 = vst.msk [vmem:[%s3598_s3 + $0x10] sm:$0xff] %vm62_vm0, %v1505_v63  ;;  %v1717_v63 = vld [vmem:[%s3595_s0 + $0x98] sm:$0xff] }
 0x1f9   :  { %v1321_v41 = vpop.permute.xlu0 %1320  ;;  %v1286_v42 = vpop.permute.xlu1 %1285 }
 0x1fa   :  { %v1514_v34 = vadd.f32 %v1321_v41, %v1226_v10  ;;  %v1507_v24 = vadd.f32 %v1286_v42, %v1219_v28  ;;  %v1234_v41 = vmul.f32 %v1717_v63, %v3072_v8  ;;  %v1718_v28 = vld [vmem:[%s3595_s0 + $0x60] sm:$0xff]  ;;  %v1727_v63 = vld [vmem:[%s3595_s0 + $0xe8] sm:$0xff] }
 0x1fc   :  { %1562 = vst.msk [vmem:[%s3598_s3 + $0x58] sm:$0xff] %vm62_vm0, %v1514_v34  ;;  %1555 = vst.msk [vmem:[%s3598_s3 + $0x20] sm:$0xff] %vm62_vm0, %v1507_v24  ;;  %v1227_v34 = vmul.f32 %v1718_v28, %v3079_v36 }
 0x1fd   :  { %v1331_v50 = vpop.permute.xlu0 %1330  ;;  %v1296_v4 = vpop.permute.xlu1 %1295 }
 0x1fe   :  { %v1516_v23 = vadd.f32 %v1331_v50, %v1228_v21  ;;  %v1509_v9 = vadd.f32 %v1296_v4, %v1221_v32  ;;  %v1236_v21 = vmul.f32 %v1719_v56, %v3086_v55  ;;  %v1720_v50 = vld [vmem:[%s3595_s0 + $0x70] sm:$0xff] }
 0x1ff   :  { %v1229_v47 = vmul.f32 %v1720_v50, %v3093_v43  ;;  %v1731_v50 = vld [vmem:[%s3595_s0 + $0x108] sm:$0xff] }
 0x200   :  { %1564 = vst.msk [vmem:[%s3598_s3 + $0x68] sm:$0xff] %vm62_vm0, %v1516_v23  ;;  %1557 = vst.msk [vmem:[%s3598_s3 + $0x30] sm:$0xff] %vm62_vm0, %v1509_v9  ;;  %v1721_v23 = vld [vmem:[%s3595_s0 + $0xb8] sm:$0xff] }
 0x201   :  { %v1341_v58 = vpop.permute.xlu0 %1340  ;;  %v1306_v49 = vpop.permute.xlu1 %1305  ;;  %v1238_v4 = vmul.f32 %v1721_v23, %v3100_v52 }
 0x202   :  { %v1518_v45 = vadd.f32 %v1341_v58, %v1230_v54  ;;  %v1511_v51 = vadd.f32 %v1306_v49, %v1223_v25  ;;  %v1722_v54 = vld [vmem:[%s3595_s0 + $0x80] sm:$0xff]  ;;  %v1240_v25 = vmul.f32 %v1723_v1, %v3114_v31  ;;  %v1724_v49 = vld [vmem:[%s3595_s0 + $0x90] sm:$0xff]  ;;  %v1735_v1 = vld [vmem:[%s3595_s0 + $0x128] sm:$0xff] }
 0x203   :  { %v1231_v9 = vmul.f32 %v1722_v54, %v3107_v12  ;;  %v1233_v46 = vmul.f32 %v1724_v49, %v3121_v11 }
 0x204   :  { %1566 = vst.msk [vmem:[%s3598_s3 + $0x78] sm:$0xff] %vm62_vm0, %v1518_v45  ;;  %1559 = vst.msk [vmem:[%s3598_s3 + $0x40] sm:$0xff] %vm62_vm0, %v1511_v51  ;;  %v1725_v51 = vld [vmem:[%s3595_s0 + $0xd8] sm:$0xff] }
 0x205   :  { %v1351_v30 = vpop.permute.xlu0 %1350  ;;  %v1316_v27 = vpop.permute.xlu1 %1315 }
 0x206   :  { %v1520_v10 = vadd.f32 %v1351_v30, %v1232_v2  ;;  %v1513_v57 = vadd.f32 %v1316_v27, %v1225_v16  ;;  %v1242_v30 = vmul.f32 %v1725_v51, %v3128_v33  ;;  %v1726_v16 = vld [vmem:[%s3595_s0 + $0xa0] sm:$0xff] }
 0x208   :  { %1568 = vst.msk [vmem:[%s3598_s3 + $0x88] sm:$0xff] %vm62_vm0, %v1520_v10  ;;  %1561 = vst.msk [vmem:[%s3598_s3 + $0x50] sm:$0xff] %vm62_vm0, %v1513_v57  ;;  %v1235_v10 = vmul.f32 %v1726_v16, %v3135_v61  ;;  %v1739_v16 = vld [vmem:[%s3595_s0 + $0x148] sm:$0xff] }
 0x209   :  { %v1361_v48 = vpop.permute.xlu0 %1360  ;;  %v1326_v8 = vpop.permute.xlu1 %1325 }
 0x20a   :  { %v1522_v42 = vadd.f32 %v1361_v48, %v1234_v41  ;;  %v1515_v24 = vadd.f32 %v1326_v8, %v1227_v34  ;;  %v1244_v41 = vmul.f32 %v1727_v63, %v3142_v5  ;;  %v1728_v48 = vld [vmem:[%s3595_s0 + $0xb0] sm:$0xff] }
 0x20b   :  { %v1237_v28 = vmul.f32 %v1728_v48, %v3149_v40 }
 0x20c   :  { %1570 = vst.msk [vmem:[%s3598_s3 + $0x98] sm:$0xff] %vm62_vm0, %v1522_v42  ;;  %1563 = vst.msk [vmem:[%s3598_s3 + $0x60] sm:$0xff] %vm62_vm0, %v1515_v24  ;;  %v1729_v42 = vld [vmem:[%s3595_s0 + $0xf8] sm:$0xff] }
 0x20d   :  { %v1371_v36 = vpop.permute.xlu0 %1370  ;;  %v1336_v55 = vpop.permute.xlu1 %1335  ;;  %v1246_v8 = vmul.f32 %v1729_v42, %v3154_v14  ;;  %v1743_v42 = vld [vmem:[%s3595_s0 + $0x168] sm:$0xff] }
 0x20e   :  { %v1524_v32 = vadd.f32 %v1371_v36, %v1236_v21  ;;  %v1517_v18 = vadd.f32 %v1336_v55, %v1229_v47  ;;  %v1730_v21 = vld [vmem:[%s3595_s0 + $0xc0] sm:$0xff]  ;;  %v1248_v47 = vmul.f32 %v1731_v50, %v3163_v53  ;;  %v1732_v55 = vld [vmem:[%s3595_s0 + $0xd0] sm:$0xff] }
 0x20f   :  { %v1239_v24 = vmul.f32 %v1730_v21, %v3158_v60  ;;  %v1241_v23 = vmul.f32 %v1732_v55, %v3167_v35 }
 0x210   :  { %1572 = vst.msk [vmem:[%s3598_s3 + $0xa8] sm:$0xff] %vm62_vm0, %v1524_v32  ;;  %1565 = vst.msk [vmem:[%s3598_s3 + $0x70] sm:$0xff] %vm62_vm0, %v1517_v18  ;;  %v1733_v18 = vld [vmem:[%s3595_s0 + $0x118] sm:$0xff] }
 0x211   :  { %v1381_v43 = vpop.permute.xlu0 %1380  ;;  %v1346_v52 = vpop.permute.xlu1 %1345 }
 0x212   :  { %v1526_v58 = vadd.f32 %v1381_v43, %v1238_v4  ;;  %v1519_v45 = vadd.f32 %v1346_v52, %v1231_v9  ;;  %v1250_v43 = vmul.f32 %v1733_v18, %v3172_v6  ;;  %v1734_v9 = vld [vmem:[%s3595_s0 + $0xe0] sm:$0xff] }
 0x213   :  { %v1748_v18 = vld [vmem:[%s3595_s0 + $0x160] sm:$0xff] }
 0x214   :  { %1574 = vst.msk [vmem:[%s3598_s3 + $0xb8] sm:$0xff] %vm62_vm0, %v1526_v58  ;;  %1567 = vst.msk [vmem:[%s3598_s3 + $0x80] sm:$0xff] %vm62_vm0, %v1519_v45  ;;  %v1243_v58 = vmul.f32 %v1734_v9, %v3176_v59 }
 0x215   :  { %v1391_v12 = vpop.permute.xlu0 %1390  ;;  %v1356_v31 = vpop.permute.xlu1 %1355 }
 0x216   :  { %v1528_v2 = vadd.f32 %v1391_v12, %v1240_v25  ;;  %v1521_v0 = vadd.f32 %v1356_v31, %v1233_v46  ;;  %v1252_v25 = vmul.f32 %v1735_v1, %v3181_v19  ;;  %v1736_v12 = vld [vmem:[%s3595_s0 + $0xf0] sm:$0xff] }
 0x217   :  { %v1245_v49 = vmul.f32 %v1736_v12, %v3183_v38 }
 0x218   :  { %1576 = vst.msk [vmem:[%s3598_s3 + $0xc8] sm:$0xff] %vm62_vm0, %v1528_v2  ;;  %1569 = vst.msk [vmem:[%s3598_s3 + $0x90] sm:$0xff] %vm62_vm0, %v1521_v0  ;;  %v1737_v2 = vld [vmem:[%s3595_s0 + $0x138] sm:$0xff] }
 0x219   :  { %v1401_v11 = vpop.permute.xlu0 %1400  ;;  %v1366_v33 = vpop.permute.xlu1 %1365  ;;  %v1254_v31 = vmul.f32 %v1737_v2, %v3185_v3 }
 0x21a   :  { %v1530_v27 = vadd.f32 %v1401_v11, %v1242_v30  ;;  %v1523_v57 = vadd.f32 %v1366_v33, %v1235_v10  ;;  %v1738_v30 = vld [vmem:[%s3595_s0 + $0x100] sm:$0xff]  ;;  %v1256_v10 = vmul.f32 %v1739_v16, %v3189_v29  ;;  %v1740_v33 = vld [vmem:[%s3595_s0 + $0x110] sm:$0xff] }
 0x21b   :  { %v1247_v0 = vmul.f32 %v1738_v30, %v3187_v44  ;;  %v1249_v63 = vmul.f32 %v1740_v33, %v3191_v62 }
 0x21c   :  { %1578 = vst.msk [vmem:[%s3598_s3 + $0xd8] sm:$0xff] %vm62_vm0, %v1530_v27  ;;  %1571 = vst.msk [vmem:[%s3598_s3 + $0xa0] sm:$0xff] %vm62_vm0, %v1523_v57  ;;  %v1741_v57 = vld [vmem:[%s3595_s0 + $0x158] sm:$0xff] }
 0x21d   :  { %v1411_v61 = vpop.permute.xlu0 %1410  ;;  %v1376_v5 = vpop.permute.xlu1 %1375 }
 0x21e   :  { %v1532_v34 = vadd.f32 %v1411_v61, %v1244_v41  ;;  %v1525_v56 = vadd.f32 %v1376_v5, %v1237_v28  ;;  %v1258_v61 = vmul.f32 %v1741_v57, %v3193_v7  ;;  %v1742_v28 = vld [vmem:[%s3595_s0 + $0x120] sm:$0xff] }
 0x220   :  { %1580 = vst.msk [vmem:[%s3598_s3 + $0xe8] sm:$0xff] %vm62_vm0, %v1532_v34  ;;  %1573 = vst.msk [vmem:[%s3598_s3 + $0xb0] sm:$0xff] %vm62_vm0, %v1525_v56  ;;  %v1251_v34 = vmul.f32 %v1742_v28, %v3195_v17 }
 0x221   :  { %v1421_v40 = vpop.permute.xlu0 %1420  ;;  %v1386_v14 = vpop.permute.xlu1 %1385 }
 0x222   :  { %v1534_v36 = vadd.f32 %v1421_v40, %v1246_v8  ;;  %v1527_v32 = vadd.f32 %v1386_v14, %v1239_v24  ;;  %v1260_v8 = vmul.f32 %v1743_v42, %v3197_v39  ;;  %v1744_v40 = vld [vmem:[%s3595_s0 + $0x130] sm:$0xff] }
 0x223   :  { %v1253_v21 = vmul.f32 %v1744_v40, %v3199_v26 }
 0x224   :  { %1582 = vst.msk [vmem:[%s3598_s3 + $0xf8] sm:$0xff] %vm62_vm0, %v1534_v36  ;;  %1575 = vst.msk [vmem:[%s3598_s3 + $0xc0] sm:$0xff] %vm62_vm0, %v1527_v32  ;;  %v1745_v36 = vld [vmem:[%s3595_s0 + $0x178] sm:$0xff] }
 0x225   :  { %v1431_v60 = vpop.permute.xlu0 %1430  ;;  %v1396_v53 = vpop.permute.xlu1 %1395  ;;  %v1262_v14 = vmul.f32 %v1745_v36, %v3201_v22 }
 0x226   :  { %v1536_v4 = vadd.f32 %v1431_v60, %v1248_v47  ;;  %v1529_v54 = vadd.f32 %v1396_v53, %v1241_v23  ;;  %v1746_v47 = vld [vmem:[%s3595_s0 + $0x140] sm:$0xff]  ;;  %v1747_v23 = vld [vmem:[%s3595_s0 + $0x150] sm:$0xff] }
 0x227   :  { %v1255_v32 = vmul.f32 %v1746_v47, %v3203_v13 }
 0x228   :  { %1584 = vst.msk [vmem:[%s3598_s3 + $0x108] sm:$0xff] %vm62_vm0, %v1536_v4  ;;  %1577 = vst.msk [vmem:[%s3598_s3 + $0xd0] sm:$0xff] %vm62_vm0, %v1529_v54  ;;  %v1257_v4 = vmul.f32 %v1747_v23, %v3209_v20 }
 0x229   :  { %v1441_v35 = vpop.permute.xlu0 %1440  ;;  %v1406_v6 = vpop.permute.xlu1 %1405 }
 0x22a   :  { %v1538_v52 = vadd.f32 %v1441_v35, %v1250_v43  ;;  %v1531_v45 = vadd.f32 %v1406_v6, %v1243_v58  ;;  %v1259_v43 = vmul.f32 %v1748_v18, %v3219_v15  ;;  %v1749_v35 = vld [vmem:[%s3595_s0 + $0x170] sm:$0xff] }
 0x22b   :  { %v1261_v9 = vmul.f32 %v1749_v35, %v3229_v37 }
 0x22c   :  { %1586 = vst.msk [vmem:[%s3598_s3 + $0x118] sm:$0xff] %vm62_vm0, %v1538_v52  ;;  %1579 = vst.msk [vmem:[%s3598_s3 + $0xe0] sm:$0xff] %vm62_vm0, %v1531_v45 }
 0x22d   :  { %v1451_v59 = vpop.permute.xlu0 %1450  ;;  %v1416_v19 = vpop.permute.xlu1 %1415 }
 0x22e   :  { %v1540_v46 = vadd.f32 %v1451_v59, %v1252_v25  ;;  %v1533_v51 = vadd.f32 %v1416_v19, %v1245_v49 }
 0x230   :  { %1588 = vst.msk [vmem:[%s3598_s3 + $0x128] sm:$0xff] %vm62_vm0, %v1540_v46  ;;  %1581 = vst.msk [vmem:[%s3598_s3 + $0xf0] sm:$0xff] %vm62_vm0, %v1533_v51 }
 0x231   :  { %v1461_v38 = vpop.permute.xlu0 %1460  ;;  %v1426_v3 = vpop.permute.xlu1 %1425 }
 0x232   :  { %v1542_v11 = vadd.f32 %v1461_v38, %v1254_v31  ;;  %v1535_v27 = vadd.f32 %v1426_v3, %v1247_v0 }
 0x234   :  { %1590 = vst.msk [vmem:[%s3598_s3 + $0x138] sm:$0xff] %vm62_vm0, %v1542_v11  ;;  %1583 = vst.msk [vmem:[%s3598_s3 + $0x100] sm:$0xff] %vm62_vm0, %v1535_v27 }
 0x235   :  { %v1471_v44 = vpop.permute.xlu0 %1470  ;;  %v1436_v29 = vpop.permute.xlu1 %1435 }
 0x236   :  { %v1544_v41 = vadd.f32 %v1471_v44, %v1256_v10  ;;  %v1537_v48 = vadd.f32 %v1436_v29, %v1249_v63 }
 0x238   :  { %1592 = vst.msk [vmem:[%s3598_s3 + $0x148] sm:$0xff] %vm62_vm0, %v1544_v41  ;;  %1585 = vst.msk [vmem:[%s3598_s3 + $0x110] sm:$0xff] %vm62_vm0, %v1537_v48 }
 0x239   :  { %v1481_v62 = vpop.permute.xlu0 %1480  ;;  %v1446_v7 = vpop.permute.xlu1 %1445 }
 0x23a   :  { %v1546_v5 = vadd.f32 %v1481_v62, %v1258_v61  ;;  %v1539_v56 = vadd.f32 %v1446_v7, %v1251_v34 }
 0x23c   :  { %1594 = vst.msk [vmem:[%s3598_s3 + $0x158] sm:$0xff] %vm62_vm0, %v1546_v5  ;;  %1587 = vst.msk [vmem:[%s3598_s3 + $0x120] sm:$0xff] %vm62_vm0, %v1539_v56 }
 0x23d   :  { %v1491_v17 = vpop.permute.xlu0 %1490  ;;  %v1456_v39 = vpop.permute.xlu1 %1455 }
 0x23e   :  { %v1548_v24 = vadd.f32 %v1491_v17, %v1260_v8  ;;  %v1541_v50 = vadd.f32 %v1456_v39, %v1253_v21 }
 0x240   :  { %1596 = vst.msk [vmem:[%s3598_s3 + $0x168] sm:$0xff] %vm62_vm0, %v1548_v24  ;;  %1589 = vst.msk [vmem:[%s3598_s3 + $0x130] sm:$0xff] %vm62_vm0, %v1541_v50 }
 0x241   :  { %v1501_v26 = vpop.permute.xlu0 %1500  ;;  %v1466_v22 = vpop.permute.xlu1 %1465 }
 0x242   :  { %v1550_v60 = vadd.f32 %v1501_v26, %v1262_v14  ;;  %v1543_v55 = vadd.f32 %v1466_v22, %v1255_v32 }
 0x244   :  { %1598 = vst.msk [vmem:[%s3598_s3 + $0x178] sm:$0xff] %vm62_vm0, %v1550_v60  ;;  %1591 = vst.msk [vmem:[%s3598_s3 + $0x140] sm:$0xff] %vm62_vm0, %v1543_v55 }
 0x245   :  { %v1476_v13 = vpop.permute.xlu1 %1475 }
 0x246   :  { %v1545_v53 = vadd.f32 %v1476_v13, %v1257_v4 }
 0x248   :  { %1593 = vst.msk [vmem:[%s3598_s3 + $0x150] sm:$0xff] %vm62_vm0, %v1545_v53 }
 0x249   :  { %v1486_v54 = vpop.permute.xlu1 %1485 }
 0x24a   :  { %v1547_v20 = vadd.f32 %v1486_v54, %v1259_v43 }
 0x24c   :  { %1595 = vst.msk [vmem:[%s3598_s3 + $0x160] sm:$0xff] %vm62_vm0, %v1547_v20 }
 0x24d   :  { %v1496_v58 = vpop.permute.xlu1 %1495 }
 0x24e   :  { %v1549_v15 = vadd.f32 %v1496_v58, %v1261_v9 }
 0x250   :  { %1597 = vst.msk [vmem:[%s3598_s3 + $0x170] sm:$0xff] %vm62_vm0, %v1549_v15 }

</bundles_post_ra>
